<compile_context>
chip_gen: v7x
topology: tpu7x:2x2x1
jax: 0.10.0
libtpu: 0.0.40
codegen_flags: <defaults>
</compile_context>

<pallas_src>
import functools

import jax
import jax.numpy as jnp
from jax.experimental import pallas as pl
from jax.experimental.pallas import tpu as pltpu

EPS = 1e-5


def transformer_layer_kernel(
    x_ref,        # (R, E)  f32, R = batch_block * S
    wq_ref,       # (E, E)  bf16  (W_q^T, pre-scaled by 1/sqrt(head_dim))
    wk_ref,       # (E, E)  bf16  (W_k^T)
    wv_ref,       # (E, E)  bf16  (W_v^T)
    bq_ref,       # (1, E)  f32   (pre-scaled)
    bk_ref,       # (1, E)  f32
    bv_ref,       # (1, E)  f32
    mask_ref,     # (H, 1, E) bf16 one-hot lane mask per head
    bias_ref,     # (R, R)  f32 additive block-diagonal batch mask (0 / -1e30)
    wo_ref,       # (E, E)  bf16  (out_proj.weight^T)
    bo_ref,       # (1, E)  f32
    ln1_w_ref,    # (1, E)  f32
    ln1_b_ref,    # (1, E)  f32
    w1_ref,       # (E, 4E) bf16
    b1_ref,       # (1, 4E) f32
    w2_ref,       # (4E, E) bf16
    b2_ref,       # (1, E)  f32
    w3_ref,       # (E, E)  bf16
    b3_ref,       # (1, E)  f32
    ln2_w_ref,    # (1, E)  f32
    ln2_b_ref,    # (1, E)  f32
    o_ref,        # (R, E)
):
    x = x_ref[...].astype(jnp.float32)               # (R, E)
    R, E = x.shape
    H = mask_ref.shape[0]
    xb = x.astype(jnp.bfloat16)

    # --- QKV projections (single lane-dense matmuls, bf16 in / f32 acc) ----
    q = jnp.dot(xb, wq_ref[...], preferred_element_type=jnp.float32) + bq_ref[...]
    k = jnp.dot(xb, wk_ref[...], preferred_element_type=jnp.float32) + bk_ref[...]
    v = jnp.dot(xb, wv_ref[...], preferred_element_type=jnp.float32) + bv_ref[...]

    # --- Multi-head attention, all heads in one batched einsum ------------
    mask = mask_ref[...]                              # (H, 1, E) bf16, one-hot per head
    qh = jnp.broadcast_to(q.astype(jnp.bfloat16)[None, :, :], (H, R, E))
    kh = k.astype(jnp.bfloat16)[None, :, :] * mask    # (H, R, E) head-h lanes only
    vh = v.astype(jnp.bfloat16)[None, :, :] * mask    # (H, R, E)

    # masking K restricts the contraction over E to head h's lanes
    s = jnp.einsum('hre,hse->hrs', qh, kh,
                   preferred_element_type=jnp.float32)        # (H, R, R)
    s = s + bias_ref[...]                                     # no cross-batch attention
    s = s - jnp.max(s, axis=-1, keepdims=True)
    p = jnp.exp(s)
    p = p * pl.reciprocal(jnp.sum(p, axis=-1, keepdims=True), approx=True)

    # masked V keeps head h's output in its own lane slot, so the head-concat
    # is just a sum over the head axis (no per-head out_proj matmuls).
    oh = jnp.einsum('hrs,hse->hre', p.astype(jnp.bfloat16), vh,
                    preferred_element_type=jnp.float32)       # (H, R, E)
    attn_cat = jnp.sum(oh, axis=0)                            # (R, E)

    attn = jnp.dot(attn_cat.astype(jnp.bfloat16), wo_ref[...],
                   preferred_element_type=jnp.float32) + bo_ref[...]
    # TODO(synk): attention/MLP dropout are stochastic; implemented as identity (eval mode).

    def layer_norm(val, g, b):
        mu = jnp.mean(val, axis=-1, keepdims=True)
        var = jnp.mean((val - mu) ** 2, axis=-1, keepdims=True)
        return (val - mu) * jax.lax.rsqrt(var + EPS) * g + b

    # --- Residual + norm1 ---------------------------------------------------
    y = layer_norm(x + attn, ln1_w_ref[...], ln1_b_ref[...])

    # --- MLP: Linear(E,4E) -> ReLU -> Linear(4E,E) -> Linear(E,E) -----------
    h1 = jnp.dot(y.astype(jnp.bfloat16), w1_ref[...],
                 preferred_element_type=jnp.float32) + b1_ref[...]
    h1 = jnp.maximum(h1, 0.0)
    h2 = jnp.dot(h1.astype(jnp.bfloat16), w2_ref[...],
                 preferred_element_type=jnp.float32) + b2_ref[...]
    h3 = jnp.dot(h2.astype(jnp.bfloat16), w3_ref[...],
                 preferred_element_type=jnp.float32) + b3_ref[...]

    # --- Residual + norm2 ---------------------------------------------------
    out = layer_norm(y + h3, ln2_w_ref[...], ln2_b_ref[...])
    o_ref[...] = out.astype(o_ref.dtype)


def pack_params(p, num_heads):
    """One-time parameter packing (do this OUTSIDE the hot path).

    Splits in_proj into Q/K/V, transposes all weights, folds the 1/sqrt(head_dim)
    attention scale into W_q/b_q, casts matmul weights to bf16, and builds the
    per-head one-hot lane mask.
    """
    E = p["out_w"].shape[0]
    hd = E // num_heads
    scale = 1.0 / (hd ** 0.5)

    wq, wk, wv = jnp.split(p["in_w"], 3, axis=0)     # each (E, E), rows = [q; k; v]
    bq, bk, bv = jnp.split(p["in_b"], 3)

    head_ids = jnp.arange(E) // hd                   # (E,)
    head_mask = (head_ids[None, :] == jnp.arange(num_heads)[:, None])
    head_mask = head_mask.astype(jnp.bfloat16)[:, None, :]   # (H, 1, E)

    return {
        "wq_t": (wq.T * scale).astype(jnp.bfloat16),
        "wk_t": wk.T.astype(jnp.bfloat16),
        "wv_t": wv.T.astype(jnp.bfloat16),
        "bq": (bq * scale)[None, :].astype(jnp.float32),
        "bk": bk[None, :].astype(jnp.float32),
        "bv": bv[None, :].astype(jnp.float32),
        "head_mask": head_mask,
        "wo_t": p["out_w"].T.astype(jnp.bfloat16),
        "bo": p["out_b"][None, :].astype(jnp.float32),
        "ln1_w": p["ln1_w"][None, :].astype(jnp.float32),
        "ln1_b": p["ln1_b"][None, :].astype(jnp.float32),
        "w1_t": p["w1"].T.astype(jnp.bfloat16),
        "b1": p["b1"][None, :].astype(jnp.float32),
        "w2_t": p["w2"].T.astype(jnp.bfloat16),
        "b2": p["b2"][None, :].astype(jnp.float32),
        "w3_t": p["w3"].T.astype(jnp.bfloat16),
        "b3": p["b3"][None, :].astype(jnp.float32),
        "ln2_w": p["ln2_w"][None, :].astype(jnp.float32),
        "ln2_b": p["ln2_b"][None, :].astype(jnp.float32),
    }


def transformer_layer(x_sbe, packed, *, batch_block=None):
    """x_sbe: (S, B, E) float32 (PyTorch MultiheadAttention convention)."""
    S, B, E = x_sbe.shape
    if batch_block is None:
        batch_block = B            # one grid step (v5e/v6e); use B//2 on v7x for megacore
    assert B % batch_block == 0
    R = batch_block * S
    H = packed["head_mask"].shape[0]

    # (S,B,E) -> (B*S, E): batch folded into rows so the MXU sees one big matmul.
    x2d = jnp.transpose(x_sbe, (1, 0, 2)).reshape(B * S, E)

    # block-diagonal additive mask: rows of different batch elements can't attend.
    bid = jnp.arange(R) // S
    attn_bias = jnp.where(bid[:, None] == bid[None, :], 0.0, -1e30).astype(jnp.float32)

    args = [
        x2d,
        packed["wq_t"], packed["wk_t"], packed["wv_t"],
        packed["bq"], packed["bk"], packed["bv"],
        packed["head_mask"], attn_bias,
        packed["wo_t"], packed["bo"],
        packed["ln1_w"], packed["ln1_b"],
        packed["w1_t"], packed["b1"],
        packed["w2_t"], packed["b2"],
        packed["w3_t"], packed["b3"],
        packed["ln2_w"], packed["ln2_b"],
    ]

    def full_spec(a):  # whole (small) parameter array resident in VMEM each step
        nd = a.ndim
        return pl.BlockSpec(a.shape, lambda i, _nd=nd: (0,) * _nd)

    in_specs = [pl.BlockSpec((R, E), lambda i: (i, 0))]
    in_specs += [full_spec(a) for a in args[1:]]
    out_spec = pl.BlockSpec((R, E), lambda i: (i, 0))

    hd = E // H
    flops = (
        2 * B * S * E * (3 * E)            # qkv projections
        + 2 * 2 * B * H * S * S * hd       # scores + PV (logical)
        + 2 * B * S * E * E                # out_proj
        + 2 * B * S * E * (4 * E)          # mlp fc1
        + 2 * B * S * (4 * E) * E          # mlp fc2
        + 2 * B * S * E * E                # mlp fc3
    )
    bytes_accessed = int(sum(a.size * a.dtype.itemsize for a in args)) + B * S * E * 4

    out2d = pl.pallas_call(
        transformer_layer_kernel,
        out_shape=jax.ShapeDtypeStruct((B * S, E), x_sbe.dtype),
        grid_spec=pltpu.PrefetchScalarGridSpec(
            num_scalar_prefetch=0,
            grid=(B // batch_block,),
            in_specs=in_specs,
            out_specs=out_spec,
        ),
        compiler_params=pltpu.CompilerParams(
            dimension_semantics=("parallel",)),
        cost_estimate=pl.CostEstimate(
            flops=int(flops),
            transcendentals=int(B * H * S * S),
            bytes_accessed=bytes_accessed),
    )(*args)

    return out2d.reshape(B, S, E).transpose(1, 0, 2)   # back to (S, B, E)


def reference_forward(x_sbe, p, num_heads=8):
    """Pure-JAX f32 reference matching PyTorch semantics (eval mode)."""
    S, B, E = x_sbe.shape
    hd = E // num_heads
    x = x_sbe.astype(jnp.float32)

    qkv = jnp.einsum('sbe,fe->sbf', x, p["in_w"]) + p["in_b"]
    q, k, v = qkv[..., :E], qkv[..., E:2 * E], qkv[..., 2 * E:]

    def split_heads(t):  # (S,B,E) -> (B,H,S,hd)
        return t.reshape(S, B, num_heads, hd).transpose(1, 2, 0, 3)

    qh = split_heads(q) * (1.0 / jnp.sqrt(hd))
    kh, vh = split_heads(k), split_heads(v)
    scores = jnp.einsum('bhsd,bhtd->bhst', qh, kh)
    pattn = jax.nn.softmax(scores, axis=-1)
    oh = jnp.einsum('bhst,bhtd->bhsd', pattn, vh)
    o = oh.transpose(2, 0, 1, 3).reshape(S, B, E)
    attn = jnp.einsum('sbe,fe->sbf', o, p["out_w"]) + p["out_b"]

    def ln(val, g, b):
        mu = val.mean(-1, keepdims=True)
        var = ((val - mu) ** 2).mean(-1, keepdims=True)
        return (val - mu) / jnp.sqrt(var + EPS) * g + b

    y = ln(x + attn, p["ln1_w"], p["ln1_b"])
    h1 = jax.nn.relu(jnp.einsum('sbe,fe->sbf', y, p["w1"]) + p["b1"])
    h2 = jnp.einsum('sbf,ef->sbe', h1, p["w2"]) + p["b2"]
    h3 = jnp.einsum('sbe,fe->sbf', h2, p["w3"]) + p["b3"]
    return ln(y + h3, p["ln2_w"], p["ln2_b"])


if __name__ == "__main__":
    S, B, E, H = 8, 2, 32, 8   # seq, batch, embed_dim, num_heads (E % H == 0)

    key = jax.random.PRNGKey(0)
    keys = jax.random.split(key, 12)
    rnd = lambda k, shape: jax.random.normal(k, shape, jnp.float32) * 0.05

    params = {
        # nn.MultiheadAttention(embed_dim=E, num_heads=H)
        "in_w": rnd(keys[0], (3 * E, E)), "in_b": rnd(keys[1], (3 * E,)),
        "out_w": rnd(keys[2], (E, E)),    "out_b": rnd(keys[3], (E,)),
        # nn.LayerNorm(E) x2
        "ln1_w": jnp.ones((E,), jnp.float32), "ln1_b": jnp.zeros((E,), jnp.float32),
        "ln2_w": jnp.ones((E,), jnp.float32), "ln2_b": jnp.zeros((E,), jnp.float32),
        # MLP: Linear(E,4E), Linear(4E,E), Linear(E,E)
        "w1": rnd(keys[4], (4 * E, E)), "b1": rnd(keys[5], (4 * E,)),
        "w2": rnd(keys[6], (E, 4 * E)), "b2": rnd(keys[7], (E,)),
        "w3": rnd(keys[8], (E, E)),     "b3": rnd(keys[9], (E,)),
    }

    x = jax.random.normal(keys[10], (S, B, E), jnp.float32)

    # Pack / transpose / bf16-cast the weights once, outside the hot path.
    packed = pack_params(params, num_heads=H)
    fwd = jax.jit(functools.partial(transformer_layer, packed=packed))

    out = fwd(x)
    out = jax.block_until_ready(out)

    ref = reference_forward(x, params, num_heads=H)
    assert out.shape == (S, B, E)
    assert jnp.all(jnp.isfinite(out))
    max_err = jnp.max(jnp.abs(out - ref))
    # bf16 matmul operands with f32 accumulation -> allow slightly looser tolerance.
    assert jnp.allclose(out, ref, rtol=2e-2, atol=2e-2), f"max abs err {max_err}"

    print("KERNEL_OK")
</pallas_src>

<mosaic_0001>
module attributes {stable_mosaic.version = 11 : i64} {
  func.func @transformer_layer_kernel(%arg0: i32, %arg1: memref<16x32xf32, #tpu.memory_space<vmem>>, %arg2: memref<32x32xbf16, #tpu.memory_space<vmem>>, %arg3: memref<32x32xbf16, #tpu.memory_space<vmem>>, %arg4: memref<32x32xbf16, #tpu.memory_space<vmem>>, %arg5: memref<1x32xf32, #tpu.memory_space<vmem>>, %arg6: memref<1x32xf32, #tpu.memory_space<vmem>>, %arg7: memref<1x32xf32, #tpu.memory_space<vmem>>, %arg8: memref<8x1x32xbf16, #tpu.memory_space<vmem>>, %arg9: memref<16x16xf32, #tpu.memory_space<vmem>>, %arg10: memref<32x32xbf16, #tpu.memory_space<vmem>>, %arg11: memref<1x32xf32, #tpu.memory_space<vmem>>, %arg12: memref<1x32xf32, #tpu.memory_space<vmem>>, %arg13: memref<1x32xf32, #tpu.memory_space<vmem>>, %arg14: memref<32x128xbf16, #tpu.memory_space<vmem>>, %arg15: memref<1x128xf32, #tpu.memory_space<vmem>>, %arg16: memref<128x32xbf16, #tpu.memory_space<vmem>>, %arg17: memref<1x32xf32, #tpu.memory_space<vmem>>, %arg18: memref<32x32xbf16, #tpu.memory_space<vmem>>, %arg19: memref<1x32xf32, #tpu.memory_space<vmem>>, %arg20: memref<1x32xf32, #tpu.memory_space<vmem>>, %arg21: memref<1x32xf32, #tpu.memory_space<vmem>>, %arg22: memref<16x32xf32, #tpu.memory_space<vmem>>) attributes {dimension_semantics = [#tpu.dimension_semantics<parallel>], iteration_bounds = array<i64: 1>, scalar_prefetch = 0 : i64, scratch_operands = 0 : i64, tpu.core_type = #tpu.core_type<tc>, window_params = [{transform_indices = @transform_0, window_bounds = array<i64: 16, 32>}, {pipeline_mode = #tpu.pipeline_mode<synchronous>, transform_indices = @transform_1, window_bounds = array<i64: 32, 32>}, {pipeline_mode = #tpu.pipeline_mode<synchronous>, transform_indices = @transform_2, window_bounds = array<i64: 32, 32>}, {pipeline_mode = #tpu.pipeline_mode<synchronous>, transform_indices = @transform_3, window_bounds = array<i64: 32, 32>}, {pipeline_mode = #tpu.pipeline_mode<synchronous>, transform_indices = @transform_4, window_bounds = array<i64: 1, 32>}, {pipeline_mode = #tpu.pipeline_mode<synchronous>, transform_indices = @transform_5, window_bounds = array<i64: 1, 32>}, {pipeline_mode = #tpu.pipeline_mode<synchronous>, transform_indices = @transform_6, window_bounds = array<i64: 1, 32>}, {pipeline_mode = #tpu.pipeline_mode<synchronous>, transform_indices = @transform_7, window_bounds = array<i64: 8, 1, 32>}, {pipeline_mode = #tpu.pipeline_mode<synchronous>, transform_indices = @transform_8, window_bounds = array<i64: 16, 16>}, {pipeline_mode = #tpu.pipeline_mode<synchronous>, transform_indices = @transform_9, window_bounds = array<i64: 32, 32>}, {pipeline_mode = #tpu.pipeline_mode<synchronous>, transform_indices = @transform_10, window_bounds = array<i64: 1, 32>}, {pipeline_mode = #tpu.pipeline_mode<synchronous>, transform_indices = @transform_11, window_bounds = array<i64: 1, 32>}, {pipeline_mode = #tpu.pipeline_mode<synchronous>, transform_indices = @transform_12, window_bounds = array<i64: 1, 32>}, {pipeline_mode = #tpu.pipeline_mode<synchronous>, transform_indices = @transform_13, window_bounds = array<i64: 32, 128>}, {pipeline_mode = #tpu.pipeline_mode<synchronous>, transform_indices = @transform_14, window_bounds = array<i64: 1, 128>}, {pipeline_mode = #tpu.pipeline_mode<synchronous>, transform_indices = @transform_15, window_bounds = array<i64: 128, 32>}, {pipeline_mode = #tpu.pipeline_mode<synchronous>, transform_indices = @transform_16, window_bounds = array<i64: 1, 32>}, {pipeline_mode = #tpu.pipeline_mode<synchronous>, transform_indices = @transform_17, window_bounds = array<i64: 32, 32>}, {pipeline_mode = #tpu.pipeline_mode<synchronous>, transform_indices = @transform_18, window_bounds = array<i64: 1, 32>}, {pipeline_mode = #tpu.pipeline_mode<synchronous>, transform_indices = @transform_19, window_bounds = array<i64: 1, 32>}, {pipeline_mode = #tpu.pipeline_mode<synchronous>, transform_indices = @transform_20, window_bounds = array<i64: 1, 32>}, {transform_indices = @transform_21, window_bounds = array<i64: 16, 32>}]} {
    %c0 = arith.constant 0 : index
    %c0_0 = arith.constant 0 : index
    %0 = vector.load %arg1[%c0, %c0_0] : memref<16x32xf32, #tpu.memory_space<vmem>>, vector<16x32xf32>
    %1 = arith.truncf %0 : vector<16x32xf32> to vector<16x32xbf16>
    %c0_1 = arith.constant 0 : index
    %c0_2 = arith.constant 0 : index
    %2 = vector.load %arg2[%c0_1, %c0_2] : memref<32x32xbf16, #tpu.memory_space<vmem>>, vector<32x32xbf16>
    %cst = arith.constant dense<0.000000e+00> : vector<16x32xf32>
    %3 = tpu.matmul %1, %2, %cst {dimension_numbers = #tpu.dot_dimension_numbers<[1], [0], [0], [1], [0, 0, 1, 1], [], []>} : vector<16x32xbf16>, vector<32x32xbf16>, vector<16x32xf32> -> vector<16x32xf32>
    %c0_3 = arith.constant 0 : index
    %c0_4 = arith.constant 0 : index
    %4 = vector.load %arg5[%c0_3, %c0_4] : memref<1x32xf32, #tpu.memory_space<vmem>>, vector<1x32xf32>
    %5 = vector.broadcast %4 : vector<1x32xf32> to vector<16x32xf32>
    %6 = arith.addf %3, %5 : vector<16x32xf32>
    %c0_5 = arith.constant 0 : index
    %c0_6 = arith.constant 0 : index
    %7 = vector.load %arg3[%c0_5, %c0_6] : memref<32x32xbf16, #tpu.memory_space<vmem>>, vector<32x32xbf16>
    %cst_7 = arith.constant dense<0.000000e+00> : vector<16x32xf32>
    %8 = tpu.matmul %1, %7, %cst_7 {dimension_numbers = #tpu.dot_dimension_numbers<[1], [0], [0], [1], [0, 0, 1, 1], [], []>} : vector<16x32xbf16>, vector<32x32xbf16>, vector<16x32xf32> -> vector<16x32xf32>
    %c0_8 = arith.constant 0 : index
    %c0_9 = arith.constant 0 : index
    %9 = vector.load %arg6[%c0_8, %c0_9] : memref<1x32xf32, #tpu.memory_space<vmem>>, vector<1x32xf32>
    %10 = vector.broadcast %9 : vector<1x32xf32> to vector<16x32xf32>
    %11 = arith.addf %8, %10 : vector<16x32xf32>
    %c0_10 = arith.constant 0 : index
    %c0_11 = arith.constant 0 : index
    %12 = vector.load %arg4[%c0_10, %c0_11] : memref<32x32xbf16, #tpu.memory_space<vmem>>, vector<32x32xbf16>
    %cst_12 = arith.constant dense<0.000000e+00> : vector<16x32xf32>
    %13 = tpu.matmul %1, %12, %cst_12 {dimension_numbers = #tpu.dot_dimension_numbers<[1], [0], [0], [1], [0, 0, 1, 1], [], []>} : vector<16x32xbf16>, vector<32x32xbf16>, vector<16x32xf32> -> vector<16x32xf32>
    %c0_13 = arith.constant 0 : index
    %c0_14 = arith.constant 0 : index
    %14 = vector.load %arg7[%c0_13, %c0_14] : memref<1x32xf32, #tpu.memory_space<vmem>>, vector<1x32xf32>
    %15 = vector.broadcast %14 : vector<1x32xf32> to vector<16x32xf32>
    %16 = arith.addf %13, %15 : vector<16x32xf32>
    %c0_15 = arith.constant 0 : index
    %c0_16 = arith.constant 0 : index
    %c0_17 = arith.constant 0 : index
    %17 = vector.load %arg8[%c0_15, %c0_16, %c0_17] : memref<8x1x32xbf16, #tpu.memory_space<vmem>>, vector<8x1x32xbf16>
    %18 = arith.truncf %6 : vector<16x32xf32> to vector<16x32xbf16>
    %19 = vector.shape_cast %18 : vector<16x32xbf16> to vector<1x16x32xbf16>
    %20 = vector.shape_cast %19 : vector<1x16x32xbf16> to vector<1x16x32xbf16>
    %21 = vector.broadcast %20 : vector<1x16x32xbf16> to vector<8x16x32xbf16>
    %22 = arith.truncf %11 : vector<16x32xf32> to vector<16x32xbf16>
    %23 = vector.shape_cast %22 : vector<16x32xbf16> to vector<1x16x32xbf16>
    %24 = vector.broadcast %23 : vector<1x16x32xbf16> to vector<8x16x32xbf16>
    %25 = vector.broadcast %17 : vector<8x1x32xbf16> to vector<8x16x32xbf16>
    %26 = arith.mulf %24, %25 : vector<8x16x32xbf16>
    %27 = arith.truncf %16 : vector<16x32xf32> to vector<16x32xbf16>
    %28 = vector.shape_cast %27 : vector<16x32xbf16> to vector<1x16x32xbf16>
    %29 = vector.broadcast %28 : vector<1x16x32xbf16> to vector<8x16x32xbf16>
    %30 = vector.broadcast %17 : vector<8x1x32xbf16> to vector<8x16x32xbf16>
    %31 = arith.mulf %29, %30 : vector<8x16x32xbf16>
    "tpu.trace_start"() <{level = 10 : i32, message = "hre,hse->hrs"}> : () -> ()
    %cst_18 = arith.constant dense<0.000000e+00> : vector<8x16x16xf32>
    %32 = tpu.matmul %21, %26, %cst_18 {dimension_numbers = #tpu.dot_dimension_numbers<[2], [2], [1], [1], [0, 0, 0, 1, 1, 1], [0], [0]>} : vector<8x16x32xbf16>, vector<8x16x32xbf16>, vector<8x16x16xf32> -> vector<8x16x16xf32>
    "tpu.trace_stop"() : () -> ()
    %c0_19 = arith.constant 0 : index
    %c0_20 = arith.constant 0 : index
    %33 = vector.load %arg9[%c0_19, %c0_20] : memref<16x16xf32, #tpu.memory_space<vmem>>, vector<16x16xf32>
    %34 = vector.shape_cast %33 : vector<16x16xf32> to vector<1x16x16xf32>
    %35 = vector.broadcast %34 : vector<1x16x16xf32> to vector<8x16x16xf32>
    %36 = arith.addf %32, %35 : vector<8x16x16xf32>
    %cst_21 = arith.constant dense<0xFF800000> : vector<8x16xf32>
    %37 = vector.multi_reduction <maximumf>, %36, %cst_21 [2] : vector<8x16x16xf32> to vector<8x16xf32>
    %38 = vector.shape_cast %37 : vector<8x16xf32> to vector<8x16x1xf32>
    %39 = vector.broadcast %38 : vector<8x16x1xf32> to vector<8x16x16xf32>
    %40 = arith.subf %36, %39 : vector<8x16x16xf32>
    %41 = math.exp %40 : vector<8x16x16xf32>
    %cst_22 = arith.constant dense<0.000000e+00> : vector<8x16xf32>
    %42 = vector.multi_reduction <add>, %41, %cst_22 [2] : vector<8x16x16xf32> to vector<8x16xf32>
    %43 = vector.shape_cast %42 : vector<8x16xf32> to vector<8x16x1xf32>
    %44 = tpu.reciprocal %43 {approx = true} : vector<8x16x1xf32> -> vector<8x16x1xf32>
    %45 = vector.broadcast %44 : vector<8x16x1xf32> to vector<8x16x16xf32>
    %46 = arith.mulf %41, %45 : vector<8x16x16xf32>
    %47 = arith.truncf %46 : vector<8x16x16xf32> to vector<8x16x16xbf16>
    "tpu.trace_start"() <{level = 10 : i32, message = "hrs,hse->hre"}> : () -> ()
    %cst_23 = arith.constant dense<0.000000e+00> : vector<8x16x32xf32>
    %48 = tpu.matmul %47, %31, %cst_23 {dimension_numbers = #tpu.dot_dimension_numbers<[2], [1], [1], [2], [0, 0, 0, 1, 1, 2], [0], [0]>} : vector<8x16x16xbf16>, vector<8x16x32xbf16>, vector<8x16x32xf32> -> vector<8x16x32xf32>
    "tpu.trace_stop"() : () -> ()
    %cst_24 = arith.constant dense<0.000000e+00> : vector<16x32xf32>
    %49 = vector.multi_reduction <add>, %48, %cst_24 [0] : vector<8x16x32xf32> to vector<16x32xf32>
    %50 = arith.truncf %49 : vector<16x32xf32> to vector<16x32xbf16>
    %c0_25 = arith.constant 0 : index
    %c0_26 = arith.constant 0 : index
    %51 = vector.load %arg10[%c0_25, %c0_26] : memref<32x32xbf16, #tpu.memory_space<vmem>>, vector<32x32xbf16>
    %cst_27 = arith.constant dense<0.000000e+00> : vector<16x32xf32>
    %52 = tpu.matmul %50, %51, %cst_27 {dimension_numbers = #tpu.dot_dimension_numbers<[1], [0], [0], [1], [0, 0, 1, 1], [], []>} : vector<16x32xbf16>, vector<32x32xbf16>, vector<16x32xf32> -> vector<16x32xf32>
    %c0_28 = arith.constant 0 : index
    %c0_29 = arith.constant 0 : index
    %53 = vector.load %arg11[%c0_28, %c0_29] : memref<1x32xf32, #tpu.memory_space<vmem>>, vector<1x32xf32>
    %54 = vector.broadcast %53 : vector<1x32xf32> to vector<16x32xf32>
    %55 = arith.addf %52, %54 : vector<16x32xf32>
    %56 = arith.addf %0, %55 : vector<16x32xf32>
    %c0_30 = arith.constant 0 : index
    %c0_31 = arith.constant 0 : index
    %57 = vector.load %arg12[%c0_30, %c0_31] : memref<1x32xf32, #tpu.memory_space<vmem>>, vector<1x32xf32>
    %c0_32 = arith.constant 0 : index
    %c0_33 = arith.constant 0 : index
    %58 = vector.load %arg13[%c0_32, %c0_33] : memref<1x32xf32, #tpu.memory_space<vmem>>, vector<1x32xf32>
    %cst_34 = arith.constant dense<0.000000e+00> : vector<16xf32>
    %59 = vector.multi_reduction <add>, %56, %cst_34 [1] : vector<16x32xf32> to vector<16xf32>
    %60 = vector.shape_cast %59 : vector<16xf32> to vector<16x1xf32>
    %cst_35 = arith.constant 3.200000e+01 : f32
    %61 = vector.broadcast %cst_35 : f32 to vector<16x1xf32>
    %62 = arith.divf %60, %61 : vector<16x1xf32>
    %63 = vector.broadcast %62 : vector<16x1xf32> to vector<16x32xf32>
    %64 = arith.subf %56, %63 : vector<16x32xf32>
    %65 = arith.mulf %64, %64 : vector<16x32xf32>
    %cst_36 = arith.constant dense<0.000000e+00> : vector<16xf32>
    %66 = vector.multi_reduction <add>, %65, %cst_36 [1] : vector<16x32xf32> to vector<16xf32>
    %67 = vector.shape_cast %66 : vector<16xf32> to vector<16x1xf32>
    %cst_37 = arith.constant 3.200000e+01 : f32
    %68 = vector.broadcast %cst_37 : f32 to vector<16x1xf32>
    %69 = arith.divf %67, %68 : vector<16x1xf32>
    %70 = vector.broadcast %62 : vector<16x1xf32> to vector<16x32xf32>
    %71 = arith.subf %56, %70 : vector<16x32xf32>
    %cst_38 = arith.constant 9.99999974E-6 : f32
    %72 = vector.broadcast %cst_38 : f32 to vector<16x1xf32>
    %73 = arith.addf %69, %72 : vector<16x1xf32>
    %74 = math.rsqrt %73 : vector<16x1xf32>
    %75 = vector.broadcast %74 : vector<16x1xf32> to vector<16x32xf32>
    %76 = arith.mulf %71, %75 : vector<16x32xf32>
    %77 = vector.broadcast %57 : vector<1x32xf32> to vector<16x32xf32>
    %78 = arith.mulf %76, %77 : vector<16x32xf32>
    %79 = vector.broadcast %58 : vector<1x32xf32> to vector<16x32xf32>
    %80 = arith.addf %78, %79 : vector<16x32xf32>
    %81 = arith.truncf %80 : vector<16x32xf32> to vector<16x32xbf16>
    %c0_39 = arith.constant 0 : index
    %c0_40 = arith.constant 0 : index
    %82 = vector.load %arg14[%c0_39, %c0_40] : memref<32x128xbf16, #tpu.memory_space<vmem>>, vector<32x128xbf16>
    %cst_41 = arith.constant dense<0.000000e+00> : vector<16x128xf32>
    %83 = tpu.matmul %81, %82, %cst_41 {dimension_numbers = #tpu.dot_dimension_numbers<[1], [0], [0], [1], [0, 0, 1, 1], [], []>} : vector<16x32xbf16>, vector<32x128xbf16>, vector<16x128xf32> -> vector<16x128xf32>
    %c0_42 = arith.constant 0 : index
    %c0_43 = arith.constant 0 : index
    %84 = vector.load %arg15[%c0_42, %c0_43] : memref<1x128xf32, #tpu.memory_space<vmem>>, vector<1x128xf32>
    %85 = vector.broadcast %84 : vector<1x128xf32> to vector<16x128xf32>
    %86 = arith.addf %83, %85 : vector<16x128xf32>
    %cst_44 = arith.constant 0.000000e+00 : f32
    %87 = vector.broadcast %cst_44 : f32 to vector<16x128xf32>
    %88 = arith.maximumf %86, %87 : vector<16x128xf32>
    %89 = arith.truncf %88 : vector<16x128xf32> to vector<16x128xbf16>
    %c0_45 = arith.constant 0 : index
    %c0_46 = arith.constant 0 : index
    %90 = vector.load %arg16[%c0_45, %c0_46] : memref<128x32xbf16, #tpu.memory_space<vmem>>, vector<128x32xbf16>
    %cst_47 = arith.constant dense<0.000000e+00> : vector<16x32xf32>
    %91 = tpu.matmul %89, %90, %cst_47 {dimension_numbers = #tpu.dot_dimension_numbers<[1], [0], [0], [1], [0, 0, 1, 1], [], []>} : vector<16x128xbf16>, vector<128x32xbf16>, vector<16x32xf32> -> vector<16x32xf32>
    %c0_48 = arith.constant 0 : index
    %c0_49 = arith.constant 0 : index
    %92 = vector.load %arg17[%c0_48, %c0_49] : memref<1x32xf32, #tpu.memory_space<vmem>>, vector<1x32xf32>
    %93 = vector.broadcast %92 : vector<1x32xf32> to vector<16x32xf32>
    %94 = arith.addf %91, %93 : vector<16x32xf32>
    %95 = arith.truncf %94 : vector<16x32xf32> to vector<16x32xbf16>
    %c0_50 = arith.constant 0 : index
    %c0_51 = arith.constant 0 : index
    %96 = vector.load %arg18[%c0_50, %c0_51] : memref<32x32xbf16, #tpu.memory_space<vmem>>, vector<32x32xbf16>
    %cst_52 = arith.constant dense<0.000000e+00> : vector<16x32xf32>
    %97 = tpu.matmul %95, %96, %cst_52 {dimension_numbers = #tpu.dot_dimension_numbers<[1], [0], [0], [1], [0, 0, 1, 1], [], []>} : vector<16x32xbf16>, vector<32x32xbf16>, vector<16x32xf32> -> vector<16x32xf32>
    %c0_53 = arith.constant 0 : index
    %c0_54 = arith.constant 0 : index
    %98 = vector.load %arg19[%c0_53, %c0_54] : memref<1x32xf32, #tpu.memory_space<vmem>>, vector<1x32xf32>
    %99 = vector.broadcast %98 : vector<1x32xf32> to vector<16x32xf32>
    %100 = arith.addf %97, %99 : vector<16x32xf32>
    %101 = arith.addf %80, %100 : vector<16x32xf32>
    %c0_55 = arith.constant 0 : index
    %c0_56 = arith.constant 0 : index
    %102 = vector.load %arg20[%c0_55, %c0_56] : memref<1x32xf32, #tpu.memory_space<vmem>>, vector<1x32xf32>
    %c0_57 = arith.constant 0 : index
    %c0_58 = arith.constant 0 : index
    %103 = vector.load %arg21[%c0_57, %c0_58] : memref<1x32xf32, #tpu.memory_space<vmem>>, vector<1x32xf32>
    %cst_59 = arith.constant dense<0.000000e+00> : vector<16xf32>
    %104 = vector.multi_reduction <add>, %101, %cst_59 [1] : vector<16x32xf32> to vector<16xf32>
    %105 = vector.shape_cast %104 : vector<16xf32> to vector<16x1xf32>
    %cst_60 = arith.constant 3.200000e+01 : f32
    %106 = vector.broadcast %cst_60 : f32 to vector<16x1xf32>
    %107 = arith.divf %105, %106 : vector<16x1xf32>
    %108 = vector.broadcast %107 : vector<16x1xf32> to vector<16x32xf32>
    %109 = arith.subf %101, %108 : vector<16x32xf32>
    %110 = arith.mulf %109, %109 : vector<16x32xf32>
    %cst_61 = arith.constant dense<0.000000e+00> : vector<16xf32>
    %111 = vector.multi_reduction <add>, %110, %cst_61 [1] : vector<16x32xf32> to vector<16xf32>
    %112 = vector.shape_cast %111 : vector<16xf32> to vector<16x1xf32>
    %cst_62 = arith.constant 3.200000e+01 : f32
    %113 = vector.broadcast %cst_62 : f32 to vector<16x1xf32>
    %114 = arith.divf %112, %113 : vector<16x1xf32>
    %115 = vector.broadcast %107 : vector<16x1xf32> to vector<16x32xf32>
    %116 = arith.subf %101, %115 : vector<16x32xf32>
    %cst_63 = arith.constant 9.99999974E-6 : f32
    %117 = vector.broadcast %cst_63 : f32 to vector<16x1xf32>
    %118 = arith.addf %114, %117 : vector<16x1xf32>
    %119 = math.rsqrt %118 : vector<16x1xf32>
    %120 = vector.broadcast %119 : vector<16x1xf32> to vector<16x32xf32>
    %121 = arith.mulf %116, %120 : vector<16x32xf32>
    %122 = vector.broadcast %102 : vector<1x32xf32> to vector<16x32xf32>
    %123 = arith.mulf %121, %122 : vector<16x32xf32>
    %124 = vector.broadcast %103 : vector<1x32xf32> to vector<16x32xf32>
    %125 = arith.addf %123, %124 : vector<16x32xf32>
    %c0_64 = arith.constant 0 : index
    %c0_65 = arith.constant 0 : index
    %126 = vector.load %arg22[%c0_64, %c0_65] : memref<16x32xf32, #tpu.memory_space<vmem>>, vector<16x32xf32>
    tpu.vector_store %arg22[%c0_64, %c0_65], %125 {strides = array<i32>} : memref<16x32xf32, #tpu.memory_space<vmem>>, vector<16x32xf32>,
    return
  }
  func.func @transform_0(%arg0: i32) -> (i32, i32) {
    %c0_i32 = arith.constant 0 : i32
    %c0_i32_0 = arith.constant 0 : i32
    return %arg0, %c0_i32 : i32, i32
  }
  func.func @transform_1(%arg0: i32) -> (i32, i32) {
    %c0_i32 = arith.constant 0 : i32
    %c0_i32_0 = arith.constant 0 : i32
    %c0_i32_1 = arith.constant 0 : i32
    return %c0_i32, %c0_i32_0 : i32, i32
  }
  func.func @transform_2(%arg0: i32) -> (i32, i32) {
    %c0_i32 = arith.constant 0 : i32
    %c0_i32_0 = arith.constant 0 : i32
    %c0_i32_1 = arith.constant 0 : i32
    return %c0_i32, %c0_i32_0 : i32, i32
  }
  func.func @transform_3(%arg0: i32) -> (i32, i32) {
    %c0_i32 = arith.constant 0 : i32
    %c0_i32_0 = arith.constant 0 : i32
    %c0_i32_1 = arith.constant 0 : i32
    return %c0_i32, %c0_i32_0 : i32, i32
  }
  func.func @transform_4(%arg0: i32) -> (i32, i32) {
    %c0_i32 = arith.constant 0 : i32
    %c0_i32_0 = arith.constant 0 : i32
    %c0_i32_1 = arith.constant 0 : i32
    return %c0_i32, %c0_i32_0 : i32, i32
  }
  func.func @transform_5(%arg0: i32) -> (i32, i32) {
    %c0_i32 = arith.constant 0 : i32
    %c0_i32_0 = arith.constant 0 : i32
    %c0_i32_1 = arith.constant 0 : i32
    return %c0_i32, %c0_i32_0 : i32, i32
  }
  func.func @transform_6(%arg0: i32) -> (i32, i32) {
    %c0_i32 = arith.constant 0 : i32
    %c0_i32_0 = arith.constant 0 : i32
    %c0_i32_1 = arith.constant 0 : i32
    return %c0_i32, %c0_i32_0 : i32, i32
  }
  func.func @transform_7(%arg0: i32) -> (i32, i32, i32) {
    %c0_i32 = arith.constant 0 : i32
    %c0_i32_0 = arith.constant 0 : i32
    %c0_i32_1 = arith.constant 0 : i32
    %c0_i32_2 = arith.constant 0 : i32
    return %c0_i32, %c0_i32_0, %c0_i32_1 : i32, i32, i32
  }
  func.func @transform_8(%arg0: i32) -> (i32, i32) {
    %c0_i32 = arith.constant 0 : i32
    %c0_i32_0 = arith.constant 0 : i32
    %c0_i32_1 = arith.constant 0 : i32
    return %c0_i32, %c0_i32_0 : i32, i32
  }
  func.func @transform_9(%arg0: i32) -> (i32, i32) {
    %c0_i32 = arith.constant 0 : i32
    %c0_i32_0 = arith.constant 0 : i32
    %c0_i32_1 = arith.constant 0 : i32
    return %c0_i32, %c0_i32_0 : i32, i32
  }
  func.func @transform_10(%arg0: i32) -> (i32, i32) {
    %c0_i32 = arith.constant 0 : i32
    %c0_i32_0 = arith.constant 0 : i32
    %c0_i32_1 = arith.constant 0 : i32
    return %c0_i32, %c0_i32_0 : i32, i32
  }
  func.func @transform_11(%arg0: i32) -> (i32, i32) {
    %c0_i32 = arith.constant 0 : i32
    %c0_i32_0 = arith.constant 0 : i32
    %c0_i32_1 = arith.constant 0 : i32
    return %c0_i32, %c0_i32_0 : i32, i32
  }
  func.func @transform_12(%arg0: i32) -> (i32, i32) {
    %c0_i32 = arith.constant 0 : i32
    %c0_i32_0 = arith.constant 0 : i32
    %c0_i32_1 = arith.constant 0 : i32
    return %c0_i32, %c0_i32_0 : i32, i32
  }
  func.func @transform_13(%arg0: i32) -> (i32, i32) {
    %c0_i32 = arith.constant 0 : i32
    %c0_i32_0 = arith.constant 0 : i32
    %c0_i32_1 = arith.constant 0 : i32
    return %c0_i32, %c0_i32_0 : i32, i32
  }
  func.func @transform_14(%arg0: i32) -> (i32, i32) {
    %c0_i32 = arith.constant 0 : i32
    %c0_i32_0 = arith.constant 0 : i32
    %c0_i32_1 = arith.constant 0 : i32
    return %c0_i32, %c0_i32_0 : i32, i32
  }
  func.func @transform_15(%arg0: i32) -> (i32, i32) {
    %c0_i32 = arith.constant 0 : i32
    %c0_i32_0 = arith.constant 0 : i32
    %c0_i32_1 = arith.constant 0 : i32
    return %c0_i32, %c0_i32_0 : i32, i32
  }
  func.func @transform_16(%arg0: i32) -> (i32, i32) {
    %c0_i32 = arith.constant 0 : i32
    %c0_i32_0 = arith.constant 0 : i32
    %c0_i32_1 = arith.constant 0 : i32
    return %c0_i32, %c0_i32_0 : i32, i32
  }
  func.func @transform_17(%arg0: i32) -> (i32, i32) {
    %c0_i32 = arith.constant 0 : i32
    %c0_i32_0 = arith.constant 0 : i32
    %c0_i32_1 = arith.constant 0 : i32
    return %c0_i32, %c0_i32_0 : i32, i32
  }
  func.func @transform_18(%arg0: i32) -> (i32, i32) {
    %c0_i32 = arith.constant 0 : i32
    %c0_i32_0 = arith.constant 0 : i32
    %c0_i32_1 = arith.constant 0 : i32
    return %c0_i32, %c0_i32_0 : i32, i32
  }
  func.func @transform_19(%arg0: i32) -> (i32, i32) {
    %c0_i32 = arith.constant 0 : i32
    %c0_i32_0 = arith.constant 0 : i32
    %c0_i32_1 = arith.constant 0 : i32
    return %c0_i32, %c0_i32_0 : i32, i32
  }
  func.func @transform_20(%arg0: i32) -> (i32, i32) {
    %c0_i32 = arith.constant 0 : i32
    %c0_i32_0 = arith.constant 0 : i32
    %c0_i32_1 = arith.constant 0 : i32
    return %c0_i32, %c0_i32_0 : i32, i32
  }
  func.func @transform_21(%arg0: i32) -> (i32, i32) {
    %c0_i32 = arith.constant 0 : i32
    %c0_i32_0 = arith.constant 0 : i32
    return %arg0, %c0_i32 : i32, i32
  }
}

</mosaic_0001>

<bundles_post_ra>
// kernel: transformer_layer.1
= control target key start
LH: loop header
LB: loop body
LE: loop exit
PB: predicated region body
PF: predicated region fallthrough
CT: control target
= control target key end

     0   :  { %s3105_s0 = inlined_call_operand.vmem [shape: f32[16,32], index: 0, kind: input, shape index: {}]   ;;  %s3106_s1 = inlined_call_operand.hbm [shape: bf16[32,32], index: 1, kind: input, shape index: {}]   ;;  %s3107_s2 = inlined_call_operand.hbm [shape: bf16[32,32], index: 2, kind: input, shape index: {}]   ;;  %s3108_s3 = inlined_call_operand.vmem [shape: bf16[32,32], index: 3, kind: input, shape index: {}]   ;;  %s3109_s4 = inlined_call_operand.hbm [shape: f32[1,32], index: 4, kind: input, shape index: {}]   ;;  %s3110_s5 = inlined_call_operand.hbm [shape: f32[1,32], index: 5, kind: input, shape index: {}]   ;;  %s3111_s6 = inlined_call_operand.hbm [shape: f32[1,32], index: 6, kind: input, shape index: {}]   ;;  %s3112_s7 = inlined_call_operand.hbm [shape: bf16[8,1,32], index: 7, kind: input, shape index: {}]   ;;  %s3113_s8 = inlined_call_operand.vmem [shape: f32[16,16], index: 8, kind: input, shape index: {}]   ;;  %s3114_s9 = inlined_call_operand.vmem [shape: bf16[32,32], index: 9, kind: input, shape index: {}]   ;;  %s3115_s10 = inlined_call_operand.hbm [shape: f32[1,32], index: 10, kind: input, shape index: {}]   ;;  %s3116_s11 = inlined_call_operand.vmem [shape: f32[1,32], index: 11, kind: input, shape index: {}, may-alias: {11,19}]   ;;  %s3117_s12 = inlined_call_operand.vmem [shape: f32[1,32], index: 12, kind: input, shape index: {}, may-alias: {12,20}]   ;;  %s3118_s13 = inlined_call_operand.vmem [shape: bf16[32,128], index: 13, kind: input, shape index: {}]   ;;  %s3119_s14 = inlined_call_operand.hbm [shape: f32[1,128], index: 14, kind: input, shape index: {}]   ;;  %s3120_s15 = inlined_call_operand.vmem [shape: bf16[128,32], index: 15, kind: input, shape index: {}]   ;;  %s3121_s16 = inlined_call_operand.hbm [shape: f32[1,32], index: 16, kind: input, shape index: {}]   ;;  %s3122_s17 = inlined_call_operand.vmem [shape: bf16[32,32], index: 17, kind: input, shape index: {}]   ;;  %s3123_s18 = inlined_call_operand.vmem [shape: f32[1,32], index: 18, kind: input, shape index: {}]   ;;  %s3124_s19 = inlined_call_operand.vmem [shape: f32[1,32], index: 19, kind: input, shape index: {}, may-alias: {11,19}]   ;;  %s3125_s20 = inlined_call_operand.vmem [shape: f32[1,32], index: 20, kind: input, shape index: {}, may-alias: {12,20}]   ;;  %s3126_s21 = inlined_call_operand.vmem [shape: f32[16,32], index: 21, kind: output, shape index: {}]  }
   0x1   :  { %3136 = sst [smem:[#allocation21_spill]] %s3105_s0 }
   0x2   :  { %3137 = sst [smem:[#allocation22_spill]] %s3106_s1 }
   0x3   :  { %3138 = sst [smem:[#allocation23_spill]] %s3107_s2 }
   0x4   :  { %3139 = sst [smem:[#allocation24_spill]] %s3108_s3 }
   0x5   :  { %3140 = sst [smem:[#allocation25_spill]] %s3109_s4 }
   0x6   :  { %3141 = sst [smem:[#allocation26_spill]] %s3110_s5 }
   0x7   :  { %3142 = sst [smem:[#allocation27_spill]] %s3126_s21 }
   0x8   :  { %26 = vsyncpa [#allocation3], 0 }
   0x9   :  { %27 = vsyncpa [#allocation5], 0 }
   0xa   :  { %28 = vsyncpa [#allocation8], 0 }
   0xb   :  { %29 = vsyncpa [#allocation11], 0 }
   0xc   :  { %30 = vsyncpa [#allocation14], 0  ;;  %s2401_s2 = smov [#allocation4]   ;;  %s2402_s26 = smov [#allocation7]  }
   0xd   :  { %s50_s25 = sshll.u32 %s2401_s2, 4  ;;  %s75_s27 = sshll.u32 %s2402_s26, 4  ;;  %s51_s25 = int_to_ptr.vmem [resolvable:$true] %s50_s25  ;;  %s2526_s27 = int_to_ptr.vmem [resolvable:$true] %s75_s27 }
   0xe   :  { %s3143_s29 = sld [smem:[#allocation23_spill]] }
  0x14   :  { %s2193_s0 = scalar_lea.hbm %s3143_s29, 256 }
  0x15   :  { %p2194_p0 = scmp.ne.s32.totalorder %s3143_s29, %s2193_s0  ;;  %p2197_p1 = scmp.lt.u32.totalorder %s2193_s0, %s3143_s29 }
  0x17   :  { %p2199_p2 = pnand %p2197_p1, %p2194_p0 }
  0x19   :  { %2202 = shalt.err (!%p2199_p2)
}
  0x1a   :  { %s2203_s23 = scalar_lea.vmem %s51_s25, 256  ;;  %p2208_p4 = scmp.lt.s32.totalorder %s51_s25, %s51_s25 }
  0x1b   :  { %p2204_p3 = scmp.ne.s32.totalorder %s51_s25, %s2203_s23  ;;  %p2209_p5 = scmp.lt.s32.totalorder %s2203_s23, %s2203_s23 }
  0x1d   :  { %p2210_p6 = por %p2209_p5, %p2208_p4 }
  0x1f   :  { %p2211_p7 = pnand %p2210_p6, %p2204_p3 }
  0x21   :  { %2214 = shalt.err (!%p2211_p7)
}
  0x22   :  { %s3133_s1 = smov 64   ;;  %s3134_s24 = smov 4  }
  0x23   :  { %56 = dma.hbm_to_vmem [thread:$0]  %s3143_s29, 256, %s51_s25, [#allocation5], %s3133_s1, %s3133_s1, %s3134_s24  }
  0x24   :  { %s3144_s0 = sld [smem:[#allocation26_spill]] }
  0x2a   :  { %s2215_s4 = scalar_lea.hbm %s3144_s0, 16 }
  0x2b   :  { %p2216_p8 = scmp.ne.s32.totalorder %s3144_s0, %s2215_s4  ;;  %p2219_p9 = scmp.lt.u32.totalorder %s2215_s4, %s3144_s0 }
  0x2d   :  { %p2221_p10 = pnand %p2219_p9, %p2216_p8 }
  0x2f   :  { %2224 = shalt.err (!%p2221_p10)
}
  0x30   :  { %s2225_s2 = scalar_lea.vmem %s2526_s27, 16  ;;  %s2229_s25 = scalar_lea.vmem %s2526_s27, 32 }
  0x31   :  { %p2226_p11 = scmp.ne.s32.totalorder %s2526_s27, %s2225_s2  ;;  %p2230_p12 = scmp.lt.s32.totalorder %s2526_s27, %s2526_s27 }
  0x32   :  { %p2231_p13 = scmp.lt.s32.totalorder %s2229_s25, %s2225_s2 }
  0x34   :  { %p2232_p0 = por %p2231_p13, %p2230_p12 }
  0x36   :  { %p2233_p1 = pnand %p2232_p0, %p2226_p11 }
  0x38   :  { %2236 = shalt.err (!%p2233_p1)
}
  0x39   :  { %78 = dma.hbm_to_vmem [thread:$0]  %s3144_s0, 16, %s2526_s27, [#allocation8]  }
  0x3a   :  { %s2405_s3 = smov [#allocation10]   ;;  %s2237_s5 = scalar_lea.hbm %s3112_s7, 128 }
  0x3b   :  { %s94_s28 = sshll.u32 %s2405_s3, 4  ;;  %p2238_p2 = scmp.ne.s32.totalorder %s3112_s7, %s2237_s5  ;;  %s95_s28 = int_to_ptr.vmem [resolvable:$true] %s94_s28 }
  0x3c   :  { %p2241_p3 = scmp.lt.u32.totalorder %s2237_s5, %s3112_s7 }
  0x3e   :  { %p2243_p4 = pnand %p2241_p3, %p2238_p2 }
  0x40   :  { %2246 = shalt.err (!%p2243_p4)
}
  0x41   :  { %s2247_s1 = scalar_lea.vmem %s95_s28, 128  ;;  %p2252_p6 = scmp.lt.s32.totalorder %s95_s28, %s95_s28 }
  0x42   :  { %p2248_p5 = scmp.ne.s32.totalorder %s95_s28, %s2247_s1  ;;  %p2253_p7 = scmp.lt.s32.totalorder %s2247_s1, %s2247_s1 }
  0x44   :  { %p2254_p8 = por %p2253_p7, %p2252_p6 }
  0x46   :  { %p2255_p9 = pnand %p2254_p8, %p2248_p5 }
  0x48   :  { %2258 = shalt.err (!%p2255_p9)
}
  0x49   :  { %s2406_s27 = smov 16   ;;  %s2407_s0 = smov 1  }
  0x4a   :  { %100 = dma.hbm_to_vmem [thread:$0]  %s3112_s7, 128, %s95_s28, [#allocation11], %s2406_s27, %s2406_s27, %s2407_s0  }
  0x4b   :  { %s2408_s3 = smov [#allocation13]   ;;  %s2409_s30 = smov [#allocation2]  }
  0x4c   :  { %s127_s4 = sshll.u32 %s2408_s3, 4  ;;  %s38_s5 = sshll.u32 %s2409_s30, 4  ;;  %s128_s4 = int_to_ptr.vmem [resolvable:$true] %s127_s4  ;;  %s39_s5 = int_to_ptr.vmem [resolvable:$true] %s38_s5 }
  0x4d   :  { %s2259_s2 = scalar_lea.hbm %s3119_s14, 16 }
  0x4e   :  { %p2260_p10 = scmp.ne.s32.totalorder %s3119_s14, %s2259_s2  ;;  %p2263_p11 = scmp.lt.u32.totalorder %s2259_s2, %s3119_s14 }
  0x50   :  { %p2265_p12 = pnand %p2263_p11, %p2260_p10 }
  0x52   :  { %2268 = shalt.err (!%p2265_p12)
}
  0x53   :  { %s2269_s7 = scalar_lea.vmem %s128_s4, 16  ;;  %s2273_s28 = scalar_lea.vmem %s128_s4, 32 }
  0x54   :  { %p2270_p13 = scmp.ne.s32.totalorder %s128_s4, %s2269_s7  ;;  %p2274_p0 = scmp.lt.s32.totalorder %s128_s4, %s128_s4 }
  0x55   :  { %p2275_p1 = scmp.lt.s32.totalorder %s2273_s28, %s2269_s7 }
  0x57   :  { %p2276_p2 = por %p2275_p1, %p2274_p0 }
  0x59   :  { %p2277_p3 = pnand %p2276_p2, %p2270_p13 }
  0x5b   :  { %2280 = shalt.err (!%p2277_p3)
}
  0x5c   :  { %130 = dma.hbm_to_vmem [thread:$0]  %s3119_s14, 16, %s128_s4, [#allocation14]  }
  0x5d   :  { %s3145_s3 = sld [smem:[#allocation22_spill]] }
  0x63   :  { %s2281_s21 = scalar_lea.hbm %s3145_s3, 256 }
  0x64   :  { %p2282_p4 = scmp.ne.s32.totalorder %s3145_s3, %s2281_s21  ;;  %p2285_p5 = scmp.lt.u32.totalorder %s2281_s21, %s3145_s3 }
  0x66   :  { %p2287_p6 = pnand %p2285_p5, %p2282_p4 }
  0x68   :  { %2290 = shalt.err (!%p2287_p6)
}
  0x69   :  { %s2291_s2 = scalar_lea.vmem %s39_s5, 256  ;;  %p2296_p8 = scmp.lt.s32.totalorder %s39_s5, %s39_s5 }
  0x6a   :  { %p2292_p7 = scmp.ne.s32.totalorder %s39_s5, %s2291_s2  ;;  %p2297_p9 = scmp.lt.s32.totalorder %s2291_s2, %s2291_s2 }
  0x6c   :  { %p2298_p10 = por %p2297_p9, %p2296_p8 }
  0x6e   :  { %p2299_p11 = pnand %p2298_p10, %p2292_p7 }
  0x70   :  { %2302 = shalt.err (!%p2299_p11)
}
  0x71   :  { %s3146_s14 = smov 4   ;;  %s3147_s4 = smov 64  }
  0x72   :  { %44 = dma.hbm_to_vmem [thread:$0]  %s3145_s3, 256, %s39_s5, [#allocation3], %s3147_s4, %s3147_s4, %s3146_s14  }
  0x73   :  { %s2410_s7 = smov [#allocation6]   ;;  %s2411_s27 = smov [#allocation9]  }
  0x74   :  { %s65_s28 = sshll.u32 %s2410_s7, 4  ;;  %s85_s0 = sshll.u32 %s2411_s27, 4  ;;  %s66_s28 = int_to_ptr.vmem [resolvable:$true] %s65_s28  ;;  %s86_s0 = int_to_ptr.vmem [resolvable:$true] %s85_s0 }
  0x75   :  { %s3148_s21 = sld [smem:[#allocation25_spill]] }
  0x7b   :  { %s2303_s24 = scalar_lea.hbm %s3148_s21, 16 }
  0x7c   :  { %p2304_p12 = scmp.ne.s32.totalorder %s3148_s21, %s2303_s24  ;;  %p2307_p13 = scmp.lt.u32.totalorder %s2303_s24, %s3148_s21 }
  0x7e   :  { %p2309_p0 = pnand %p2307_p13, %p2304_p12 }
  0x80   :  { %2312 = shalt.err (!%p2309_p0)
}
  0x81   :  { %s2313_s5 = scalar_lea.vmem %s66_s28, 16  ;;  %s2317_s3 = scalar_lea.vmem %s66_s28, 32 }
  0x82   :  { %p2314_p1 = scmp.ne.s32.totalorder %s66_s28, %s2313_s5  ;;  %p2318_p2 = scmp.lt.s32.totalorder %s66_s28, %s66_s28 }
  0x83   :  { %p2319_p3 = scmp.lt.s32.totalorder %s2317_s3, %s2313_s5 }
  0x85   :  { %p2320_p4 = por %p2319_p3, %p2318_p2 }
  0x87   :  { %p2321_p5 = pnand %p2320_p4, %p2314_p1 }
  0x89   :  { %2324 = shalt.err (!%p2321_p5)
}
  0x8a   :  { %68 = dma.hbm_to_vmem [thread:$0]  %s3148_s21, 16, %s66_s28, [#allocation5]  }
  0x8b   :  { %s2325_s7 = scalar_lea.hbm %s3111_s6, 16 }
  0x8c   :  { %p2326_p6 = scmp.ne.s32.totalorder %s3111_s6, %s2325_s7  ;;  %p2329_p7 = scmp.lt.u32.totalorder %s2325_s7, %s3111_s6 }
  0x8e   :  { %p2331_p8 = pnand %p2329_p7, %p2326_p6 }
  0x90   :  { %2334 = shalt.err (!%p2331_p8)
}
  0x91   :  { %s2335_s30 = scalar_lea.vmem %s86_s0, 16  ;;  %s2339_s22 = scalar_lea.vmem %s86_s0, 32 }
  0x92   :  { %p2336_p9 = scmp.ne.s32.totalorder %s86_s0, %s2335_s30  ;;  %p2340_p10 = scmp.lt.s32.totalorder %s86_s0, %s86_s0 }
  0x93   :  { %p2341_p11 = scmp.lt.s32.totalorder %s2339_s22, %s2335_s30 }
  0x95   :  { %p2342_p12 = por %p2341_p11, %p2340_p10 }
  0x97   :  { %p2343_p13 = pnand %p2342_p12, %p2336_p9 }
  0x99   :  { %2346 = shalt.err (!%p2343_p13)
}
  0x9a   :  { %88 = dma.hbm_to_vmem [thread:$0]  %s3111_s6, 16, %s86_s0, [#allocation8]  }
  0x9b   :  { %s2412_s23 = smov [#allocation12]   ;;  %s2413_s5 = smov [#allocation15]  }
  0x9c   :  { %s111_s2 = sshll.u32 %s2412_s23, 4  ;;  %s139_s3 = sshll.u32 %s2413_s5, 4  ;;  %s112_s2 = int_to_ptr.vmem [resolvable:$true] %s111_s2  ;;  %s140_s3 = int_to_ptr.vmem [resolvable:$true] %s139_s3 }
  0x9d   :  { %s2347_s25 = scalar_lea.hbm %s3115_s10, 16 }
  0x9e   :  { %p2348_p0 = scmp.ne.s32.totalorder %s3115_s10, %s2347_s25  ;;  %p2351_p1 = scmp.lt.u32.totalorder %s2347_s25, %s3115_s10 }
  0xa0   :  { %p2353_p2 = pnand %p2351_p1, %p2348_p0 }
  0xa2   :  { %2356 = shalt.err (!%p2353_p2)
}
  0xa3   :  { %s2357_s6 = scalar_lea.vmem %s112_s2, 16  ;;  %s2361_s0 = scalar_lea.vmem %s112_s2, 32 }
  0xa4   :  { %p2358_p3 = scmp.ne.s32.totalorder %s112_s2, %s2357_s6  ;;  %p2362_p4 = scmp.lt.s32.totalorder %s112_s2, %s112_s2 }
  0xa5   :  { %p2363_p5 = scmp.lt.s32.totalorder %s2361_s0, %s2357_s6 }
  0xa7   :  { %p2364_p6 = por %p2363_p5, %p2362_p4 }
  0xa9   :  { %p2365_p7 = pnand %p2364_p6, %p2358_p3 }
  0xab   :  { %2368 = shalt.err (!%p2365_p7)
}
  0xac   :  { %114 = dma.hbm_to_vmem [thread:$0]  %s3115_s10, 16, %s112_s2, [#allocation11]  }
  0xad   :  { %s2369_s28 = scalar_lea.hbm %s3121_s16, 16 }
  0xae   :  { %p2370_p8 = scmp.ne.s32.totalorder %s3121_s16, %s2369_s28  ;;  %p2373_p9 = scmp.lt.u32.totalorder %s2369_s28, %s3121_s16 }
  0xb0   :  { %p2375_p10 = pnand %p2373_p9, %p2370_p8 }
  0xb2   :  { %2378 = shalt.err (!%p2375_p10)
}
  0xb3   :  { %s2379_s4 = scalar_lea.vmem %s140_s3, 16  ;;  %s2383_s25 = scalar_lea.vmem %s140_s3, 32 }
  0xb4   :  { %p2380_p11 = scmp.ne.s32.totalorder %s140_s3, %s2379_s4  ;;  %p2384_p12 = scmp.lt.s32.totalorder %s140_s3, %s140_s3 }
  0xb5   :  { %p2385_p13 = scmp.lt.s32.totalorder %s2383_s25, %s2379_s4 }
  0xb7   :  { %p2386_p0 = por %p2385_p13, %p2384_p12 }
  0xb9   :  { %p2387_p1 = pnand %p2386_p0, %p2380_p11 }
  0xbb   :  { %2390 = shalt.err (!%p2387_p1)
}
  0xbc   :  { %142 = dma.hbm_to_vmem [thread:$0]  %s3121_s16, 16, %s140_s3, [#allocation14]  }
  0xbd   :  { %2391 = dma.done.wait [#allocation3], 256  }
  0xbe   :  { %2392 = vsyncadd [#allocation3], 4294967040 }
  0xbf   :  { %2393 = dma.done.wait [#allocation5], 272  }
  0xc0   :  { %2394 = vsyncadd [#allocation5], 4294967024 }
  0xc1   :  { %2395 = dma.done.wait [#allocation8], 32  }
  0xc2   :  { %2396 = vsyncadd [#allocation8], 4294967264 }
  0xc3   :  { %2397 = dma.done.wait [#allocation11], 144  }
  0xc4   :  { %2398 = vsyncadd [#allocation11], 4294967152 }
  0xc5   :  { %2399 = dma.done.wait [#allocation14], 32  }
  0xc6   :  { %2400 = vsyncadd [#allocation14], 4294967264  ;;  %v2414_v0 = vmov 0.0   ;;  %vm2415_vm0 = vmmov 0   ;;  %v2099_v1 = vld [vmem:[#allocation2] sm:$0xff]   ;;  %v2100_v2 = vld [vmem:[#allocation2 + $0x8] sm:$0xff]   ;;  %v391_v10 = vlaneseq }
  0xc7   :  { %1920 = vmatprep.subr.bf16.mxu0 %v2414_v0  ;;  %1924 = vmatprep.mubr.msk.bf16.mxu0 %vm2415_vm0, %v2414_v0  ;;  %s3149_s1 = sld [smem:[#allocation21_spill]]  ;;  %vm205_vm1 = vcmask 261120   ;;  %v2101_v5 = vld [vmem:[#allocation4] sm:$0xff]   ;;  %v2102_v7 = vld [vmem:[#allocation4 + $0x8] sm:$0xff]   ;;  %s3150_s0 = sld [smem:[#allocation24_spill]]  ;;  %vm818_vm2 = vcmask 130048  }
  0xc8   :  { %1944 = vmatprep.subr.bf16.mxu1 %v2414_v0  ;;  %1946 = vmatprep.mubr.msk.bf16.mxu1 %vm2415_vm0, %v2414_v0  ;;  %v1808_v11 = vld [vmem:[#allocation6] ss:$0 sm:$0xff]  ;;  %v392_v18 = vshrl.u32 %v391_v10, 7  ;;  %v378_v19 = vld [vmem:[#allocation10] sm:$0x1]  ;;  %s3151_s6 = sld [smem:[#allocation27_spill]] }
  0xc9   :  { %1921 = vmatpush3.bf16.msra.mxu0 %v2099_v1  ;;  %v379_v20 = vld [vmem:[#allocation10 + $0x1] sm:$0x1]  ;;  %v389_v22 = vpack.i.b16 %v378_v19, %v378_v19  ;;  %v1812_v25 = vld [vmem:[#allocation7] ss:$0 sm:$0xff]  ;;  %v380_v29 = vld [vmem:[#allocation10 + $0x2] sm:$0x1] }
  0xca   :  { %1922 = vmatprep.subr.bf16.mxu0 %v2414_v0  ;;  %v393_v23 = vsub.s32 0, %v392_v18  ;;  %v396_v24 = vpack.i.b16 %v379_v20, %v379_v20  ;;  %v381_v30 = vld [vmem:[#allocation10 + $0x3] sm:$0x1]  ;;  %v403_v37 = vpack.i.b16 %v380_v29, %v380_v29  ;;  %v382_v45 = vld [vmem:[#allocation10 + $0x4] sm:$0x1] }
  0xcb   :  { %v410_v38 = vpack.i.b16 %v381_v30, %v381_v30  ;;  %v383_v46 = vld [vmem:[#allocation10 + $0x5] sm:$0x1]  ;;  %v417_v49 = vpack.i.b16 %v382_v45, %v382_v45  ;;  %v384_v55 = vld [vmem:[#allocation10 + $0x6] sm:$0x1]  ;;  %v385_v56 = vld [vmem:[#allocation10 + $0x7] sm:$0x1] }
  0xcc   :  { %v2683_v34 = vrot.slane %v389_v22, %v393_v23  ;;  %v2685_v35 = vrot.slane %v396_v24, %v393_v23  ;;  %v2691_v43 = vrot.slane %v403_v37, %v393_v23  ;;  %v424_v50 = vpack.i.b16 %v383_v46, %v383_v46  ;;  %v2771_v19 = vld [vmem:[%s3113_s8 + $0x8] sm:$0xff] }
  0xcd   :  { %v179_v3 = vld [vmem:[%s3149_s1] sm:$0xff]  ;;  %v180_v4 = vld [vmem:[%s3149_s1 + $0x8] sm:$0xff]  ;;  %1923 = vmatpush3.bf16.msra.mxu0 %v2100_v2  ;;  %v2693_v44 = vrot.slane %v410_v38, %v393_v23  ;;  %v2705_v53 = vrot.slane %v417_v49, %v393_v23  ;;  %v431_v59 = vpack.i.b16 %v384_v55, %v384_v55  ;;  %v438_v60 = vpack.i.b16 %v385_v56, %v385_v56 }
  0xce   :  { %v181_v6 = vpack.c.bf16 %v180_v4, %v179_v3  ;;  %1928 = vmatprep.subr.bf16.mxu0 %v2414_v0  ;;  %v2103_v8 = vld [vmem:[%s3150_s0] sm:$0xff]   ;;  %v2104_v9 = vld [vmem:[%s3150_s0 + $0x8] sm:$0xff]   ;;  %v2707_v54 = vrot.slane %v424_v50, %v393_v23 }
  0xcf   :  { %v2723_v63 = vrot.slane %v431_v59, %v393_v23  ;;  %v2725_v1 = vrot.slane %v438_v60, %v393_v23 }
  0xd0   :  { %1925 = vmatmul.mubr.msk.bf16.vlgmr.msra.gmra.mrb[0].mxu0 %vm205_vm1, %v181_v6 }
  0xd1   :  { %1929 = vmatpush3.bf16.msra.mxu0 %v2101_v5  ;;  %1932 = vmatprep.mubr.msk.bf16.mxu0 %vm2415_vm0, %v2414_v0 }
  0xd2   :  { %1930 = vmatprep.subr.bf16.mxu0 %v2414_v0 }
  0xd5   :  { %1931 = vmatpush3.bf16.msra.mxu0 %v2102_v7 }
  0xd6   :  { %1936 = vmatprep.subr.bf16.mxu0 %v2414_v0 }
  0xd8   :  { %1933 = vmatmul.mubr.msk.bf16.vlgmr.msra.gmra.mrb[4].mxu0 %vm205_vm1, %v181_v6 }
  0xd9   :  { %1940 = vmatprep.mubr.msk.bf16.mxu0 %vm2415_vm0, %v2414_v0  ;;  %1937 = vmatpush3.bf16.msra.mxu0 %v2103_v8 }
  0xda   :  { %1938 = vmatprep.subr.bf16.mxu0 %v2414_v0 }
  0xdd   :  { %1939 = vmatpush3.bf16.msra.mxu0 %v2104_v9 }
  0xde   :  { %1950 = vmatprep.subr.bf16.mxu0 %v2414_v0 }
  0xe0   :  { %1941 = vmatmul.mubr.msk.bf16.vlgmr.msra.gmra.mrb[8].mxu0 %vm205_vm1, %v181_v6  ;;  %v1816_v6 = vld [vmem:[#allocation9] ss:$0 sm:$0xff] }
  0xe1   :  { %1952 = vmatprep.mubr.msk.bf16.mxu0 %vm2415_vm0, %v2414_v0 }
 0x1a3   :  { %v243_v12 = vpop.f32.mrb[0].mxu0 }
 0x1a4   :  { %v1926_v13 = vpop.f32.mrb[1].mxu0  ;;  %v244_v15 = vadd.f32 %v1808_v11, %v243_v12 }
 0x1a5   :  { %v246_v14 = vpop.f32.mrb[2].mxu0 }
 0x1a6   :  { %v247_v16 = vadd.f32 %v1808_v11, %v246_v14  ;;  %v1927_v17 = vpop.f32.mrb[3].mxu0 }
 0x1a8   :  { %v2681_v21 = vpack.c.bf16 %v247_v16, %v244_v15  ;;  %v2766_v16 = vld [vmem:[%s3113_s8] sm:$0xff] }
 0x1ab   :  { %v307_v26 = vpop.f32.mrb[4].mxu0 }
 0x1ac   :  { %v1934_v27 = vpop.f32.mrb[5].mxu0  ;;  %v308_v31 = vadd.f32 %v1812_v25, %v307_v26 }
 0x1ad   :  { %v310_v28 = vpop.f32.mrb[6].mxu0 }
 0x1ae   :  { %v311_v32 = vadd.f32 %v1812_v25, %v310_v28  ;;  %v1935_v33 = vpop.f32.mrb[7].mxu0 }
 0x1b0   :  { %v387_v36 = vpack.c.bf16 %v311_v32, %v308_v31 }
 0x1b2   :  { %v444_v39 = vmul.bf16 %v2683_v34, %v387_v36  ;;  %v445_v40 = vmul.bf16 %v2685_v35, %v387_v36  ;;  %v446_v47 = vmul.bf16 %v2691_v43, %v387_v36  ;;  %v447_v48 = vmul.bf16 %v2693_v44, %v387_v36 }
 0x1b3   :  { %v448_v57 = vmul.bf16 %v2705_v53, %v387_v36  ;;  %v449_v58 = vmul.bf16 %v2707_v54, %v387_v36  ;;  %v450_v2 = vmul.bf16 %v2723_v63, %v387_v36  ;;  %v451_v3 = vmul.bf16 %v2725_v1, %v387_v36  ;;  %v371_v7 = vpop.f32.mrb[8].mxu0 }
 0x1b4   :  { %v467_v41 = vsel %vm205_vm1, %v444_v39, 0  ;;  %v511_v42 = vsel %vm205_vm1, %v445_v40, 0  ;;  %v555_v51 = vsel %vm205_vm1, %v446_v47, 0  ;;  %v599_v52 = vsel %vm205_vm1, %v447_v48, 0  ;;  %v1942_v9 = vpop.f32.mrb[9].mxu0 }
 0x1b5   :  { %1945 = vmatpush3.bf16.xpose.msra.mxu1 %v467_v41  ;;  %1951 = vmatpush3.bf16.xpose.msra.mxu0 %v511_v42  ;;  %v643_v61 = vsel %vm205_vm1, %v448_v57, 0  ;;  %v687_v62 = vsel %vm205_vm1, %v449_v58, 0  ;;  %v731_v4 = vsel %vm205_vm1, %v450_v2, 0  ;;  %v775_v5 = vsel %vm205_vm1, %v451_v3, 0  ;;  %v374_v10 = vpop.f32.mrb[10].mxu0 }
 0x1b6   :  { %1956 = vmatprep.subr.bf16.mxu1 %v2414_v0  ;;  %1962 = vmatprep.subr.bf16.mxu0 %v2414_v0  ;;  %v372_v8 = vadd.f32 %v1816_v6, %v371_v7  ;;  %v375_v11 = vadd.f32 %v1816_v6, %v374_v10  ;;  %v1943_v12 = vpop.f32.mrb[11].mxu0 }
 0x1b8   :  { %v2755_v13 = vpack.c.bf16 %v375_v11, %v372_v8 }
 0x1ba   :  { %v453_v14 = vmul.bf16 %v2755_v13, %v2683_v34  ;;  %v454_v15 = vmul.bf16 %v2755_v13, %v2685_v35 }
 0x1bc   :  { %1947 = vmatmul.mubr.msk.bf16.vlgmr.msra.gmra.mrb[0].mxu1 %vm205_vm1, %v2681_v21  ;;  %1953 = vmatmul.mubr.msk.bf16.vlgmr.msra.gmra.mrb[12].mxu0 %vm205_vm1, %v2681_v21 }
 0x1bd   :  { %1957 = vmatpush3.bf16.xpose.msra.mxu1 %v555_v51  ;;  %1963 = vmatpush3.bf16.xpose.msra.mxu0 %v599_v52 }
 0x1be   :  { %1958 = vmatprep.mubr.msk.bf16.mxu1 %vm2415_vm0, %v2414_v0  ;;  %1964 = vmatprep.mubr.msk.bf16.mxu0 %vm2415_vm0, %v2414_v0 }
 0x1bf   :  { %1968 = vmatprep.subr.bf16.mxu1 %v2414_v0  ;;  %1974 = vmatprep.subr.bf16.mxu0 %v2414_v0 }
 0x1c4   :  { %1959 = vmatmul.mubr.msk.bf16.vlgmr.msra.gmra.mrb[4].mxu1 %vm205_vm1, %v2681_v21  ;;  %1965 = vmatmul.mubr.msk.bf16.vlgmr.msra.gmra.mrb[16].mxu0 %vm205_vm1, %v2681_v21 }
 0x1c5   :  { %1969 = vmatpush3.bf16.xpose.msra.mxu1 %v643_v61  ;;  %1975 = vmatpush3.bf16.xpose.msra.mxu0 %v687_v62 }
 0x1c6   :  { %1970 = vmatprep.mubr.msk.bf16.mxu1 %vm2415_vm0, %v2414_v0  ;;  %1976 = vmatprep.mubr.msk.bf16.mxu0 %vm2415_vm0, %v2414_v0 }
 0x1c7   :  { %1980 = vmatprep.subr.bf16.mxu1 %v2414_v0  ;;  %1986 = vmatprep.subr.bf16.mxu0 %v2414_v0 }
 0x1cc   :  { %1971 = vmatmul.mubr.msk.bf16.vlgmr.msra.gmra.mrb[8].mxu1 %vm205_vm1, %v2681_v21  ;;  %1977 = vmatmul.mubr.msk.bf16.vlgmr.msra.gmra.mrb[20].mxu0 %vm205_vm1, %v2681_v21 }
 0x1cd   :  { %1981 = vmatpush3.bf16.xpose.msra.mxu1 %v731_v4  ;;  %1987 = vmatpush3.bf16.xpose.msra.mxu0 %v775_v5 }
 0x1ce   :  { %1982 = vmatprep.mubr.msk.bf16.mxu1 %vm2415_vm0, %v2414_v0  ;;  %1988 = vmatprep.mubr.msk.bf16.mxu0 %vm2415_vm0, %v2414_v0 }
 0x1cf   :  { %1992 = vmatprep.subr.bf16.mxu1 %v2414_v0  ;;  %1998 = vmatprep.subr.bf16.mxu0 %v2414_v0 }
 0x1d4   :  { %1983 = vmatmul.mubr.msk.bf16.vlgmr.msra.gmra.mrb[12].mxu1 %vm205_vm1, %v2681_v21  ;;  %1989 = vmatmul.mubr.msk.bf16.vlgmr.msra.gmra.mrb[24].mxu0 %vm205_vm1, %v2681_v21 }
 0x1d5   :  { %1994 = vmatprep.mubr.msk.bf16.mxu1 %vm2415_vm0, %v2414_v0  ;;  %2000 = vmatprep.mubr.msk.bf16.mxu0 %vm2415_vm0, %v2414_v0 }
 0x1d6   :  { %1993 = vmatpush3.bf16.msra.mxu1 %v453_v14  ;;  %1999 = vmatpush3.bf16.msra.mxu0 %v454_v15 }
 0x1d7   :  { %2004 = vmatprep.subr.bf16.mxu1 %v2414_v0  ;;  %2010 = vmatprep.subr.bf16.mxu0 %v2414_v0 }
 0x28f   :  { %v503_v17 = vpop.f32.mrb[0].mxu1  ;;  %v547_v18 = vpop.f32.mrb[12].mxu0 }
 0x290   :  { %v2774_v20 = vadd.f32 %v503_v17, %v2766_v16  ;;  %v2777_v21 = vadd.f32 %v547_v18, %v2766_v16  ;;  %v1948_v22 = vpop.f32.mrb[1].mxu1  ;;  %v1954_v23 = vpop.f32.mrb[13].mxu0 }
 0x291   :  { %v506_v24 = vpop.f32.mrb[2].mxu1  ;;  %v550_v25 = vpop.f32.mrb[14].mxu0 }
 0x292   :  { %v2780_v26 = vadd.f32 %v506_v24, %v2771_v19  ;;  %v2783_v27 = vadd.f32 %v550_v25, %v2771_v19  ;;  %v1949_v28 = vpop.f32.mrb[3].mxu1  ;;  %v1955_v29 = vpop.f32.mrb[15].mxu0  ;;  %v819_v30 = vsel %vm818_vm2, %v2774_v20, -inf  ;;  %v825_v31 = vsel %vm818_vm2, %v2777_v21, -inf }
 0x293   :  { %820 = vmax.xlane.f32.xlu0 %v819_v30  ;;  %826 = vmax.xlane.f32.xlu1 %v825_v31 }
 0x294   :  { %v822_v32 = vsel %vm818_vm2, %v2780_v26, -inf  ;;  %v828_v33 = vsel %vm818_vm2, %v2783_v27, -inf }
 0x297   :  { %823 = vmax.xlane.f32.xlu0 %v822_v32  ;;  %v591_v34 = vpop.f32.mrb[4].mxu1  ;;  %829 = vmax.xlane.f32.xlu1 %v828_v33  ;;  %v635_v35 = vpop.f32.mrb[16].mxu0 }
 0x298   :  { %v2794_v36 = vadd.f32 %v591_v34, %v2766_v16  ;;  %v1960_v37 = vpop.f32.mrb[5].mxu1  ;;  %v1966_v38 = vpop.f32.mrb[17].mxu0  ;;  %v2797_v41 = vadd.f32 %v635_v35, %v2766_v16 }
 0x299   :  { %v594_v39 = vpop.f32.mrb[6].mxu1  ;;  %v638_v40 = vpop.f32.mrb[18].mxu0 }
 0x29a   :  { %v2800_v42 = vadd.f32 %v594_v39, %v2771_v19  ;;  %v1961_v45 = vpop.f32.mrb[7].mxu1  ;;  %v1967_v46 = vpop.f32.mrb[19].mxu0  ;;  %v831_v47 = vsel %vm818_vm2, %v2794_v36, -inf  ;;  %v2805_v48 = vadd.f32 %v638_v40, %v2771_v19  ;;  %v837_v50 = vsel %vm818_vm2, %v2797_v41, -inf }
 0x29b   :  { %832 = vmax.xlane.f32.xlu0 %v831_v47 }
 0x29c   :  { %v834_v49 = vsel %vm818_vm2, %v2800_v42, -inf  ;;  %v840_v58 = vsel %vm818_vm2, %v2805_v48, -inf }
 0x29d   :  { %835 = vmax.xlane.f32.xlu1 %v834_v49 }
 0x29f   :  { %v679_v51 = vpop.f32.mrb[8].mxu1  ;;  %838 = vmax.xlane.f32.xlu0 %v837_v50  ;;  %v723_v52 = vpop.f32.mrb[20].mxu0 }
 0x2a0   :  { %v2812_v55 = vadd.f32 %v679_v51, %v2766_v16  ;;  %v1972_v56 = vpop.f32.mrb[9].mxu1  ;;  %v1978_v57 = vpop.f32.mrb[21].mxu0  ;;  %v2817_v61 = vadd.f32 %v723_v52, %v2766_v16 }
 0x2a1   :  { %v682_v59 = vpop.f32.mrb[10].mxu1  ;;  %841 = vmax.xlane.f32.xlu1 %v840_v58  ;;  %v726_v60 = vpop.f32.mrb[22].mxu0 }
 0x2a2   :  { %v2820_v62 = vadd.f32 %v682_v59, %v2771_v19  ;;  %v1973_v2 = vpop.f32.mrb[11].mxu1  ;;  %v1979_v3 = vpop.f32.mrb[23].mxu0  ;;  %v843_v4 = vsel %vm818_vm2, %v2812_v55, -inf  ;;  %v2825_v5 = vadd.f32 %v726_v60, %v2771_v19  ;;  %v849_v7 = vsel %vm818_vm2, %v2817_v61, -inf }
 0x2a3   :  { %844 = vmax.xlane.f32.xlu0 %v843_v4 }
 0x2a4   :  { %v846_v6 = vsel %vm818_vm2, %v2820_v62, -inf  ;;  %v852_v14 = vsel %vm818_vm2, %v2825_v5, -inf }
 0x2a5   :  { %847 = vmax.xlane.f32.xlu1 %v846_v6 }
 0x2a7   :  { %v767_v8 = vpop.f32.mrb[12].mxu1  ;;  %850 = vmax.xlane.f32.xlu0 %v849_v7  ;;  %v811_v9 = vpop.f32.mrb[24].mxu0 }
 0x2a8   :  { %v2832_v10 = vadd.f32 %v767_v8, %v2766_v16  ;;  %v1984_v11 = vpop.f32.mrb[13].mxu1  ;;  %v1990_v12 = vpop.f32.mrb[25].mxu0  ;;  %v2837_v18 = vadd.f32 %v811_v9, %v2766_v16 }
 0x2a9   :  { %v770_v15 = vpop.f32.mrb[14].mxu1  ;;  %853 = vmax.xlane.f32.xlu1 %v852_v14  ;;  %v814_v17 = vpop.f32.mrb[26].mxu0 }
 0x2aa   :  { %v2840_v22 = vadd.f32 %v770_v15, %v2771_v19  ;;  %v1985_v23 = vpop.f32.mrb[15].mxu1  ;;  %v1991_v24 = vpop.f32.mrb[27].mxu0  ;;  %v855_v25 = vsel %vm818_vm2, %v2832_v10, -inf  ;;  %v2845_v28 = vadd.f32 %v814_v17, %v2771_v19  ;;  %v861_v16 = vsel %vm818_vm2, %v2837_v18, -inf }
 0x2ab   :  { %856 = vmax.xlane.f32.xlu0 %v855_v25 }
 0x2ac   :  { %v858_v29 = vsel %vm818_vm2, %v2840_v22, -inf  ;;  %v864_v30 = vsel %vm818_vm2, %v2845_v28, -inf }
 0x2ad   :  { %859 = vmax.xlane.f32.xlu1 %v858_v29 }
 0x2af   :  { %862 = vmax.xlane.f32.xlu0 %v861_v16 }
 0x2b1   :  { %865 = vmax.xlane.f32.xlu1 %v864_v30 }
 0x320   :  { %v821_v31 = vpop.xlane.xlu0 %820  ;;  %v827_v32 = vpop.xlane.xlu1 %826 }
 0x321   :  { %v867_v33 = vsub.f32 %v2774_v20, %v821_v31  ;;  %v869_v34 = vsub.f32 %v2777_v21, %v827_v32 }
 0x323   :  { %v883_v19 = vmul.f32 1.442695, %v867_v33  ;;  %v887_v35 = vmul.f32 1.442695, %v869_v34 }
 0x324   :  { %v824_v37 = vpop.xlane.xlu0 %823  ;;  %v830_v38 = vpop.xlane.xlu1 %829 }
 0x325   :  { %2119 = vpow2.f32 %v883_v19  ;;  %v868_v39 = vsub.f32 %v2780_v26, %v824_v37  ;;  %v870_v40 = vsub.f32 %v2783_v27, %v830_v38 }
 0x326   :  { %2121 = vpow2.f32 %v887_v35 }
 0x327   :  { %v885_v45 = vmul.f32 1.442695, %v868_v39  ;;  %v889_v46 = vmul.f32 1.442695, %v870_v40 }
 0x328   :  { %v833_v47 = vpop.xlane.xlu0 %832 }
 0x329   :  { %2123 = vpow2.f32 %v885_v45  ;;  %v871_v49 = vsub.f32 %v2794_v36, %v833_v47 }
 0x32a   :  { %v836_v50 = vpop.xlane.xlu1 %835  ;;  %2125 = vpow2.f32 %v889_v46 }
 0x32b   :  { %v891_v20 = vmul.f32 1.442695, %v871_v49  ;;  %v872_v21 = vsub.f32 %v2800_v42, %v836_v50 }
 0x32c   :  { %v839_v51 = vpop.xlane.xlu0 %838 }
 0x32d   :  { %2127 = vpow2.f32 %v891_v20  ;;  %v893_v52 = vmul.f32 1.442695, %v872_v21  ;;  %v873_v56 = vsub.f32 %v2797_v41, %v839_v51 }
 0x32e   :  { %v842_v26 = vpop.xlane.xlu1 %841 }
 0x32f   :  { %v2860_v57 = vpop.eup %2119  ;;  %2129 = vpow2.f32 %v893_v52  ;;  %v895_v27 = vmul.f32 1.442695, %v873_v56  ;;  %v874_v58 = vsub.f32 %v2805_v48, %v842_v26 }
 0x330   :  { %v845_v59 = vpop.xlane.xlu0 %844  ;;  %v915_v36 = vsel %vm818_vm2, %v2860_v57, 0.0  ;;  %v2865_v60 = vpop.eup %2121 }
 0x331   :  { %2131 = vpow2.f32 %v895_v27  ;;  %v897_v42 = vmul.f32 1.442695, %v874_v58  ;;  %v875_v2 = vsub.f32 %v2812_v55, %v845_v59  ;;  %916 = vadd.xlane.f32.xlu0 %v915_v36  ;;  %v921_v48 = vsel %vm818_vm2, %v2865_v60, 0.0 }
 0x332   :  { %v848_v3 = vpop.xlane.xlu1 %847 }
 0x333   :  { %v2868_v41 = vpop.eup %2123  ;;  %2133 = vpow2.f32 %v897_v42  ;;  %v899_v4 = vmul.f32 1.442695, %v875_v2  ;;  %v876_v6 = vsub.f32 %v2820_v62, %v848_v3 }
 0x334   :  { %v851_v7 = vpop.xlane.xlu0 %850  ;;  %v918_v8 = vsel %vm818_vm2, %v2868_v41, 0.0  ;;  %v2875_v9 = vpop.eup %2125 }
 0x335   :  { %2135 = vpow2.f32 %v899_v4  ;;  %v901_v11 = vmul.f32 1.442695, %v876_v6  ;;  %v877_v55 = vsub.f32 %v2817_v61, %v851_v7  ;;  %922 = vadd.xlane.f32.xlu0 %v921_v48  ;;  %919 = vadd.xlane.f32.xlu1 %v918_v8  ;;  %v924_v24 = vsel %vm818_vm2, %v2875_v9, 0.0 }
 0x336   :  { %v854_v12 = vpop.xlane.xlu1 %853 }
 0x337   :  { %v2878_v14 = vpop.eup %2127  ;;  %2137 = vpow2.f32 %v901_v11  ;;  %v903_v62 = vmul.f32 1.442695, %v877_v55  ;;  %v878_v15 = vsub.f32 %v2825_v5, %v854_v12 }
 0x338   :  { %v857_v17 = vpop.xlane.xlu0 %856  ;;  %v927_v23 = vsel %vm818_vm2, %v2878_v14, 0.0 }
 0x339   :  { %v2885_v25 = vpop.eup %2129  ;;  %2139 = vpow2.f32 %v903_v62  ;;  %v905_v61 = vmul.f32 1.442695, %v878_v15  ;;  %v879_v29 = vsub.f32 %v2832_v10, %v857_v17  ;;  %928 = vadd.xlane.f32.xlu0 %v927_v23  ;;  %925 = vadd.xlane.f32.xlu1 %v924_v24 }
 0x33a   :  { %v860_v16 = vpop.xlane.xlu1 %859  ;;  %v930_v34 = vsel %vm818_vm2, %v2885_v25, 0.0 }
 0x33b   :  { %v2888_v30 = vpop.eup %2131  ;;  %2141 = vpow2.f32 %v905_v61  ;;  %v907_v5 = vmul.f32 1.442695, %v879_v29  ;;  %v880_v31 = vsub.f32 %v2840_v22, %v860_v16  ;;  %v455_v61 = vmul.bf16 %v2755_v13, %v2691_v43 }
 0x33c   :  { %v863_v32 = vpop.xlane.xlu0 %862  ;;  %v933_v33 = vsel %vm818_vm2, %v2888_v30, 0.0  ;;  %v456_v43 = vmul.bf16 %v2755_v13, %v2693_v44  ;;  %v457_v44 = vmul.bf16 %v2755_v13, %v2705_v53  ;;  %v458_v53 = vmul.bf16 %v2755_v13, %v2707_v54 }
 0x33d   :  { %v2895_v19 = vpop.eup %2133  ;;  %2143 = vpow2.f32 %v907_v5  ;;  %v909_v10 = vmul.f32 1.442695, %v880_v31  ;;  %v881_v35 = vsub.f32 %v2837_v18, %v863_v32  ;;  %934 = vadd.xlane.f32.xlu0 %v933_v33  ;;  %931 = vadd.xlane.f32.xlu1 %v930_v34  ;;  %v459_v54 = vmul.bf16 %v2755_v13, %v2723_v63 }
 0x33e   :  { %v866_v37 = vpop.xlane.xlu1 %865  ;;  %v936_v45 = vsel %vm818_vm2, %v2895_v19, 0.0 }
 0x33f   :  { %v2898_v38 = vpop.eup %2135  ;;  %2145 = vpow2.f32 %v909_v10  ;;  %v911_v22 = vmul.f32 1.442695, %v881_v35  ;;  %v882_v39 = vsub.f32 %v2845_v28, %v866_v37 }
 0x340   :  { %v939_v40 = vsel %vm818_vm2, %v2898_v38, 0.0 }
 0x341   :  { %v2905_v46 = vpop.eup %2137  ;;  %2147 = vpow2.f32 %v911_v22  ;;  %v913_v47 = vmul.f32 1.442695, %v882_v39  ;;  %940 = vadd.xlane.f32.xlu0 %v939_v40  ;;  %937 = vadd.xlane.f32.xlu1 %v936_v45 }
 0x342   :  { %v942_v28 = vsel %vm818_vm2, %v2905_v46, 0.0 }
 0x343   :  { %v2907_v18 = vpop.eup %2139  ;;  %2149 = vpow2.f32 %v913_v47 }
 0x344   :  { %v945_v49 = vsel %vm818_vm2, %v2907_v18, 0.0 }
 0x345   :  { %v2913_v50 = vpop.eup %2141  ;;  %946 = vadd.xlane.f32.xlu0 %v945_v49  ;;  %943 = vadd.xlane.f32.xlu1 %v942_v28 }
 0x346   :  { %v948_v51 = vsel %vm818_vm2, %v2913_v50, 0.0 }
 0x347   :  { %v2915_v20 = vpop.eup %2143 }
 0x348   :  { %v951_v21 = vsel %vm818_vm2, %v2915_v20, 0.0 }
 0x349   :  { %v2921_v52 = vpop.eup %2145  ;;  %952 = vadd.xlane.f32.xlu0 %v951_v21  ;;  %949 = vadd.xlane.f32.xlu1 %v948_v51 }
 0x34a   :  { %v954_v27 = vsel %vm818_vm2, %v2921_v52, 0.0 }
 0x34b   :  { %v2923_v56 = vpop.eup %2147 }
 0x34c   :  { %v957_v26 = vsel %vm818_vm2, %v2923_v56, 0.0 }
 0x34d   :  { %v2929_v58 = vpop.eup %2149  ;;  %958 = vadd.xlane.f32.xlu0 %v957_v26  ;;  %955 = vadd.xlane.f32.xlu1 %v954_v27 }
 0x34e   :  { %v960_v59 = vsel %vm818_vm2, %v2929_v58, 0.0 }
 0x351   :  { %961 = vadd.xlane.f32.xlu1 %v960_v59  ;;  %v460_v59 = vmul.bf16 %v2755_v13, %v2725_v1  ;;  %v2105_v13 = vld [vmem:[%s3114_s9] sm:$0xff]  }
 0x3be   :  { %v917_v36 = vpop.xlane.xlu0 %916 }
 0x3bf   :  { %2151 = vrcp.f32 %v917_v36 }
 0x3c2   :  { %v923_v42 = vpop.xlane.xlu0 %922  ;;  %v920_v2 = vpop.xlane.xlu1 %919 }
 0x3c3   :  { %2153 = vrcp.f32 %v920_v2 }
 0x3c4   :  { %2155 = vrcp.f32 %v923_v42 }
 0x3c6   :  { %v929_v3 = vpop.xlane.xlu0 %928  ;;  %v926_v4 = vpop.xlane.xlu1 %925 }
 0x3c7   :  { %2157 = vrcp.f32 %v926_v4 }
 0x3c8   :  { %2159 = vrcp.f32 %v929_v3 }
 0x3c9   :  { %v2152_v48 = vpop.eup %2151 }
 0x3ca   :  { %v935_v6 = vpop.xlane.xlu0 %934  ;;  %v932_v7 = vpop.xlane.xlu1 %931  ;;  %v979_v12 = vmul.f32 %v2152_v48, %v2860_v57 }
 0x3cb   :  { %2161 = vrcp.f32 %v932_v7 }
 0x3cc   :  { %2163 = vrcp.f32 %v935_v6 }
 0x3cd   :  { %v2154_v8 = vpop.eup %2153 }
 0x3ce   :  { %v941_v11 = vpop.xlane.xlu0 %940  ;;  %v938_v55 = vpop.xlane.xlu1 %937  ;;  %v980_v62 = vmul.f32 %v2154_v8, %v2868_v41 }
 0x3cf   :  { %v2156_v15 = vpop.eup %2155  ;;  %2165 = vrcp.f32 %v938_v55 }
 0x3d0   :  { %v995_v17 = vpack.c.bf16 %v980_v62, %v979_v12  ;;  %2167 = vrcp.f32 %v941_v11  ;;  %v981_v16 = vmul.f32 %v2156_v15, %v2865_v60 }
 0x3d1   :  { %v2158_v23 = vpop.eup %2157 }
 0x3d2   :  { %v947_v24 = vpop.xlane.xlu0 %946  ;;  %v944_v29 = vpop.xlane.xlu1 %943  ;;  %v982_v5 = vmul.f32 %v2158_v23, %v2875_v9  ;;  %1995 = vmatmul.mubr.msk.bf16.vlgmr.msra.gmra.mrb[16].mxu1 %vm818_vm2, %v995_v17 }
 0x3d3   :  { %v2160_v31 = vpop.eup %2159  ;;  %2005 = vmatpush3.bf16.msra.mxu1 %v455_v61  ;;  %2169 = vrcp.f32 %v944_v29  ;;  %2006 = vmatprep.mubr.msk.bf16.mxu1 %vm2415_vm0, %v2414_v0 }
 0x3d4   :  { %v996_v57 = vpack.c.bf16 %v982_v5, %v981_v16  ;;  %2016 = vmatprep.subr.bf16.mxu1 %v2414_v0  ;;  %2171 = vrcp.f32 %v947_v24  ;;  %v983_v9 = vmul.f32 %v2160_v31, %v2878_v14 }
 0x3d5   :  { %v2162_v41 = vpop.eup %2161 }
 0x3d6   :  { %v953_v32 = vpop.xlane.xlu0 %952  ;;  %v950_v60 = vpop.xlane.xlu1 %949  ;;  %v984_v33 = vmul.f32 %v2162_v41, %v2885_v25  ;;  %2001 = vmatmul.mubr.msk.bf16.vlgmr.msra.gmra.mrb[28].mxu0 %vm818_vm2, %v996_v57 }
 0x3d7   :  { %v2164_v34 = vpop.eup %2163  ;;  %2011 = vmatpush3.bf16.msra.mxu0 %v456_v43  ;;  %2173 = vrcp.f32 %v950_v60  ;;  %2012 = vmatprep.mubr.msk.bf16.mxu0 %vm2415_vm0, %v2414_v0 }
 0x3d8   :  { %v997_v10 = vpack.c.bf16 %v984_v33, %v983_v9  ;;  %2022 = vmatprep.subr.bf16.mxu0 %v2414_v0  ;;  %2175 = vrcp.f32 %v953_v32  ;;  %v985_v25 = vmul.f32 %v2164_v34, %v2888_v30 }
 0x3d9   :  { %v2166_v35 = vpop.eup %2165 }
 0x3da   :  { %v959_v37 = vpop.xlane.xlu0 %958  ;;  %v956_v14 = vpop.xlane.xlu1 %955  ;;  %v986_v22 = vmul.f32 %v2166_v35, %v2895_v19  ;;  %2007 = vmatmul.mubr.msk.bf16.vlgmr.msra.gmra.mrb[20].mxu1 %vm818_vm2, %v997_v10 }
 0x3db   :  { %v2168_v39 = vpop.eup %2167  ;;  %2017 = vmatpush3.bf16.msra.mxu1 %v457_v44  ;;  %2177 = vrcp.f32 %v956_v14  ;;  %2018 = vmatprep.mubr.msk.bf16.mxu1 %vm2415_vm0, %v2414_v0 }
 0x3dc   :  { %2179 = vrcp.f32 %v959_v37  ;;  %v998_v40 = vpack.c.bf16 %v986_v22, %v985_v25  ;;  %2028 = vmatprep.subr.bf16.mxu1 %v2414_v0  ;;  %v987_v30 = vmul.f32 %v2168_v39, %v2898_v38 }
 0x3dd   :  { %v2170_v45 = vpop.eup %2169 }
 0x3de   :  { %v962_v47 = vpop.xlane.xlu1 %961  ;;  %v988_v19 = vmul.f32 %v2170_v45, %v2905_v46  ;;  %2013 = vmatmul.mubr.msk.bf16.vlgmr.msra.gmra.mrb[32].mxu0 %vm818_vm2, %v998_v40  ;;  %v2172_v49 = vpop.eup %2171 }
 0x3df   :  { %2181 = vrcp.f32 %v962_v47  ;;  %2023 = vmatpush3.bf16.msra.mxu0 %v458_v53  ;;  %2024 = vmatprep.mubr.msk.bf16.mxu0 %vm2415_vm0, %v2414_v0  ;;  %v989_v51 = vmul.f32 %v2172_v49, %v2907_v18 }
 0x3e0   :  { %v999_v28 = vpack.c.bf16 %v988_v19, %v987_v30  ;;  %2034 = vmatprep.subr.bf16.mxu0 %v2414_v0 }
 0x3e1   :  { %v2174_v21 = vpop.eup %2173 }
 0x3e2   :  { %v990_v38 = vmul.f32 %v2174_v21, %v2913_v50  ;;  %2019 = vmatmul.mubr.msk.bf16.vlgmr.msra.gmra.mrb[24].mxu1 %vm818_vm2, %v999_v28  ;;  %v2176_v46 = vpop.eup %2175 }
 0x3e3   :  { %2029 = vmatpush3.bf16.msra.mxu1 %v459_v54  ;;  %2030 = vmatprep.mubr.msk.bf16.mxu1 %vm2415_vm0, %v2414_v0  ;;  %v991_v63 = vmul.f32 %v2176_v46, %v2915_v20  ;;  %v2106_v20 = vld [vmem:[%s3114_s9 + $0x8] sm:$0xff]  }
 0x3e4   :  { %v1000_v26 = vpack.c.bf16 %v990_v38, %v989_v51  ;;  %2040 = vmatprep.subr.bf16.mxu1 %v2414_v0 }
 0x3e5   :  { %v2178_v27 = vpop.eup %2177 }
 0x3e6   :  { %v2180_v36 = vpop.eup %2179  ;;  %v992_v18 = vmul.f32 %v2178_v27, %v2921_v52  ;;  %2025 = vmatmul.mubr.msk.bf16.vlgmr.msra.gmra.mrb[36].mxu0 %vm818_vm2, %v1000_v26 }
 0x3e7   :  { %2035 = vmatpush3.bf16.msra.mxu0 %v460_v59  ;;  %2036 = vmatprep.mubr.msk.bf16.mxu0 %vm2415_vm0, %v2414_v0  ;;  %v993_v2 = vmul.f32 %v2180_v36, %v2923_v56 }
 0x3e8   :  { %v1001_v42 = vpack.c.bf16 %v992_v18, %v991_v63  ;;  %2048 = vmatprep.subr.bf16.mxu0 %v2414_v0 }
 0x3e9   :  { %v2182_v50 = vpop.eup %2181 }
 0x3ea   :  { %v994_v3 = vmul.f32 %v2182_v50, %v2929_v58  ;;  %2031 = vmatmul.mubr.msk.bf16.vlgmr.msra.gmra.mrb[28].mxu1 %vm818_vm2, %v1001_v42 }
 0x3eb   :  { %2044 = vmatprep.mubr.msk.bf16.mxu1 %vm2415_vm0, %v2414_v0  ;;  %2041 = vmatpush3.bf16.msra.mxu1 %v2105_v13 }
 0x3ec   :  { %v1002_v1 = vpack.c.bf16 %v994_v3, %v993_v2  ;;  %2042 = vmatprep.subr.bf16.mxu1 %v2414_v0 }
 0x3ee   :  { %2037 = vmatmul.mubr.msk.bf16.vlgmr.msra.gmra.mrb[40].mxu0 %vm818_vm2, %v1002_v1 }
 0x3ef   :  { %2052 = vmatprep.mubr.msk.bf16.mxu0 %vm2415_vm0, %v2414_v0  ;;  %2043 = vmatpush3.bf16.msra.mxu1 %v2106_v20 }
 0x3f0   :  { %2056 = vmatprep.subr.bf16.mxu1 %v2414_v0 }
 0x4a5   :  { %v1040_v52 = vpop.f32.mrb[16].mxu1 }
 0x4a6   :  { %v1996_v56 = vpop.f32.mrb[17].mxu1  ;;  %v1355_v7 = vsel %vm205_vm1, %v1040_v52, 0.0  ;;  %v1836_v52 = vld [vmem:[#allocation12] ss:$0 sm:$0xff] }
 0x4a7   :  { %v1043_v58 = vpop.f32.mrb[18].mxu1 }
 0x4a8   :  { %v1997_v4 = vpop.f32.mrb[19].mxu1  ;;  %v1370_v12 = vsel %vm205_vm1, %v1043_v58, 0.0 }
 0x4a9   :  { %v1084_v6 = vpop.f32.mrb[28].mxu0 }
 0x4aa   :  { %v1356_v48 = vsel %vm205_vm1, %v1084_v6, 0.0  ;;  %v2002_v8 = vpop.f32.mrb[29].mxu0 }
 0x4ab   :  { %v1357_v11 = vadd.f32 %v1356_v48, %v1355_v7  ;;  %v1087_v55 = vpop.f32.mrb[30].mxu0  ;;  %v2191_v8 = vld [vmem:[%s3149_s1] sm:$0xff] }
 0x4ac   :  { %v1371_v62 = vsel %vm205_vm1, %v1087_v55, 0.0  ;;  %v2003_v15 = vpop.f32.mrb[31].mxu0 }
 0x4ad   :  { %v1372_v17 = vadd.f32 %v1371_v62, %v1370_v12  ;;  %v1128_v23 = vpop.f32.mrb[20].mxu1  ;;  %v2192_v12 = vld [vmem:[%s3149_s1 + $0x8] sm:$0xff] }
 0x4ae   :  { %v1358_v24 = vsel %vm205_vm1, %v1128_v23, 0.0  ;;  %v2008_v61 = vpop.f32.mrb[21].mxu1 }
 0x4af   :  { %v1359_v29 = vadd.f32 %v1358_v24, %v1357_v11  ;;  %v1131_v16 = vpop.f32.mrb[22].mxu1 }
 0x4b0   :  { %v1373_v5 = vsel %vm205_vm1, %v1131_v16, 0.0  ;;  %v2009_v31 = vpop.f32.mrb[23].mxu1 }
 0x4b1   :  { %v1374_v57 = vadd.f32 %v1373_v5, %v1372_v17  ;;  %v1172_v41 = vpop.f32.mrb[32].mxu0 }
 0x4b2   :  { %v1360_v32 = vsel %vm205_vm1, %v1172_v41, 0.0  ;;  %v2014_v43 = vpop.f32.mrb[33].mxu0 }
 0x4b3   :  { %v1361_v60 = vadd.f32 %v1360_v32, %v1359_v29  ;;  %v1175_v9 = vpop.f32.mrb[34].mxu0  ;;  %v2107_v32 = vld [vmem:[%s3118_s13] sm:$0xff]   ;;  %v2108_v43 = vld [vmem:[%s3118_s13 + $0x8] sm:$0xff]  }
 0x4b4   :  { %v1375_v33 = vsel %vm205_vm1, %v1175_v9, 0.0  ;;  %v2015_v34 = vpop.f32.mrb[35].mxu0  ;;  %2049 = vmatpush3.bf16.msra.mxu0 %v2107_v32  ;;  %v2110_v9 = vld [vmem:[%s3120_s15 + $0x8] sm:$0xff]  }
 0x4b5   :  { %v1376_v10 = vadd.f32 %v1375_v33, %v1374_v57  ;;  %v1216_v35 = vpop.f32.mrb[24].mxu1  ;;  %2050 = vmatprep.subr.bf16.mxu0 %v2414_v0  ;;  %v2111_v33 = vld [vmem:[%s3120_s15 + $0x10] sm:$0xff]   ;;  %v2112_v34 = vld [vmem:[%s3120_s15 + $0x18] sm:$0xff]  }
 0x4b6   :  { %v1362_v37 = vsel %vm205_vm1, %v1216_v35, 0.0  ;;  %v2020_v44 = vpop.f32.mrb[25].mxu1  ;;  %v2114_v35 = vld [vmem:[%s3120_s15 + $0x28] sm:$0xff]  }
 0x4b7   :  { %v1363_v14 = vadd.f32 %v1362_v37, %v1361_v60  ;;  %v1219_v25 = vpop.f32.mrb[26].mxu1  ;;  %v2109_v60 = vld [vmem:[%s3120_s15] sm:$0xff]  }
 0x4b8   :  { %v1377_v22 = vsel %vm205_vm1, %v1219_v25, 0.0  ;;  %v2021_v39 = vpop.f32.mrb[27].mxu1  ;;  %2051 = vmatpush3.bf16.msra.mxu0 %v2108_v43 }
 0x4b9   :  { %v1378_v40 = vadd.f32 %v1377_v22, %v1376_v10  ;;  %v1260_v45 = vpop.f32.mrb[36].mxu0  ;;  %2076 = vmatprep.subr.bf16.mxu0 %v2414_v0  ;;  %v2113_v10 = vld [vmem:[%s3120_s15 + $0x20] sm:$0xff]  }
 0x4ba   :  { %v1364_v53 = vsel %vm205_vm1, %v1260_v45, 0.0  ;;  %v2026_v47 = vpop.f32.mrb[37].mxu0  ;;  %v1840_v45 = vld [vmem:[%s3116_s11] ss:$0 sm:$0xff] }
 0x4bb   :  { %v1365_v30 = vadd.f32 %v1364_v53, %v1363_v14  ;;  %v1263_v19 = vpop.f32.mrb[38].mxu0 }
 0x4bc   :  { %v1379_v49 = vsel %vm205_vm1, %v1263_v19, 0.0  ;;  %v2027_v28 = vpop.f32.mrb[39].mxu0 }
 0x4bd   :  { %v1380_v21 = vadd.f32 %v1379_v49, %v1378_v40  ;;  %v1304_v54 = vpop.f32.mrb[28].mxu1  ;;  %v1841_v49 = vld [vmem:[%s3117_s12] ss:$0 sm:$0xff] }
 0x4be   :  { %v1366_v51 = vsel %vm205_vm1, %v1304_v54, 0.0  ;;  %v2032_v38 = vpop.f32.mrb[29].mxu1 }
 0x4bf   :  { %v1367_v46 = vadd.f32 %v1366_v51, %v1365_v30  ;;  %v1307_v26 = vpop.f32.mrb[30].mxu1  ;;  %v2115_v38 = vld [vmem:[%s3120_s15 + $0x30] sm:$0xff]  }
 0x4c0   :  { %v1381_v27 = vsel %vm205_vm1, %v1307_v26, 0.0  ;;  %v2033_v59 = vpop.f32.mrb[31].mxu1  ;;  %v1842_v26 = vld [vmem:[#allocation13] ss:$0 sm:$0xff] }
 0x4c1   :  { %v1382_v36 = vadd.f32 %v1381_v27, %v1380_v21  ;;  %v1348_v63 = vpop.f32.mrb[40].mxu0 }
 0x4c2   :  { %v1368_v18 = vsel %vm205_vm1, %v1348_v63, 0.0  ;;  %v2038_v50 = vpop.f32.mrb[41].mxu0 }
 0x4c3   :  { %v1369_v42 = vadd.f32 %v1368_v18, %v1367_v46  ;;  %v1351_v2 = vpop.f32.mrb[42].mxu0  ;;  %v2116_v46 = vld [vmem:[%s3120_s15 + $0x38] sm:$0xff]  }
 0x4c4   :  { %v1383_v3 = vsel %vm205_vm1, %v1351_v2, 0.0  ;;  %v2039_v1 = vpop.f32.mrb[43].mxu0 }
 0x4c5   :  { %v1384_v13 = vadd.f32 %v1383_v3, %v1382_v36  ;;  %v2117_v1 = vld [vmem:[%s3122_s17] sm:$0xff]  }
 0x4c7   :  { %v1385_v20 = vpack.c.bf16 %v1384_v13, %v1369_v42  ;;  %v2118_v13 = vld [vmem:[%s3122_s17 + $0x8] sm:$0xff]  }
 0x4c9   :  { %2045 = vmatmul.mubr.msk.bf16.vlgmr.msra.gmra.mrb[32].mxu1 %vm205_vm1, %v1385_v20  ;;  %v1846_v20 = vld [vmem:[#allocation15] ss:$0 sm:$0xff] }
 0x4ca   :  { %2072 = vmatprep.mubr.msk.bf16.mxu1 %vm2415_vm0, %v2414_v0  ;;  %2057 = vmatpush3.bf16.msra.mxu1 %v2109_v60 }
 0x4cb   :  { %2058 = vmatprep.subr.bf16.mxu1 %v2414_v0 }
 0x4ce   :  { %2059 = vmatpush3.bf16.msra.mxu1 %v2110_v9 }
 0x4cf   :  { %2060 = vmatprep.subr.bf16.mxu1 %v2414_v0 }
 0x4d2   :  { %2061 = vmatpush3.bf16.msra.mxu1 %v2111_v33 }
 0x4d3   :  { %2062 = vmatprep.subr.bf16.mxu1 %v2414_v0 }
 0x4d6   :  { %2063 = vmatpush3.bf16.msra.mxu1 %v2112_v34 }
 0x4d7   :  { %2064 = vmatprep.subr.bf16.mxu1 %v2414_v0 }
 0x4da   :  { %2065 = vmatpush3.bf16.msra.mxu1 %v2113_v10 }
 0x4db   :  { %2066 = vmatprep.subr.bf16.mxu1 %v2414_v0 }
 0x4de   :  { %2067 = vmatpush3.bf16.msra.mxu1 %v2114_v35 }
 0x4df   :  { %2068 = vmatprep.subr.bf16.mxu1 %v2414_v0 }
 0x4e2   :  { %2069 = vmatpush3.bf16.msra.mxu1 %v2115_v38 }
 0x4e3   :  { %2070 = vmatprep.subr.bf16.mxu1 %v2414_v0 }
 0x4e6   :  { %2071 = vmatpush3.bf16.msra.mxu1 %v2116_v46 }
 0x59c   :  { %v1446_v56 = vpop.f32.mrb[32].mxu1 }
 0x59d   :  { %v1447_v58 = vadd.f32 %v1836_v52, %v1446_v56  ;;  %v2046_v4 = vpop.f32.mrb[33].mxu1 }
 0x59e   :  { %v1449_v6 = vpop.f32.mrb[34].mxu1 }
 0x59f   :  { %v1450_v7 = vadd.f32 %v1836_v52, %v1449_v6  ;;  %v2047_v48 = vpop.f32.mrb[35].mxu1  ;;  %v1453_v11 = vadd.f32 %v2191_v8, %v1447_v58  ;;  %v1855_v8 = vld [vmem:[%s3123_s18] ss:$0 sm:$0xff] }
 0x5a1   :  { %v1457_v55 = vsel %vm205_vm1, %v1453_v11, 0.0  ;;  %v1454_v62 = vadd.f32 %v2192_v12, %v1450_v7 }
 0x5a2   :  { %1458 = vadd.xlane.f32.xlu0 %v1457_v55 }
 0x5a3   :  { %v1460_v15 = vsel %vm205_vm1, %v1454_v62, 0.0 }
 0x5a4   :  { %1461 = vadd.xlane.f32.xlu1 %v1460_v15 }
 0x62f   :  { %v1459_v17 = vpop.xlane.xlu0 %1458 }
 0x630   :  { %v1464_v23 = vmul.f32 0.03125, %v1459_v17 }
 0x631   :  { %v1462_v24 = vpop.xlane.xlu1 %1461 }
 0x632   :  { %v1466_v61 = vsub.f32 %v1453_v11, %v1464_v23  ;;  %v1465_v29 = vmul.f32 0.03125, %v1462_v24 }
 0x634   :  { %v1467_v16 = vsub.f32 %v1454_v62, %v1465_v29  ;;  %v1468_v5 = vmul.f32 %v1466_v61, %v1466_v61 }
 0x636   :  { %v1470_v31 = vsel %vm205_vm1, %v1468_v5, 0.0  ;;  %v1469_v57 = vmul.f32 %v1467_v16, %v1467_v16 }
 0x637   :  { %1471 = vadd.xlane.f32.xlu0 %v1470_v31 }
 0x638   :  { %v1473_v41 = vsel %vm205_vm1, %v1469_v57, 0.0 }
 0x639   :  { %1474 = vadd.xlane.f32.xlu1 %v1473_v41 }
 0x6c4   :  { %v1472_v37 = vpop.xlane.xlu0 %1471 }
 0x6c5   :  { %v1476_v44 = vmul.f32 0.03125, %v1472_v37 }
 0x6c6   :  { %v1475_v14 = vpop.xlane.xlu1 %1474 }
 0x6c7   :  { %v1478_v25 = vadd.f32 1e-05, %v1476_v44  ;;  %v1477_v22 = vmul.f32 0.03125, %v1475_v14 }
 0x6c9   :  { %2183 = vrsqrt.f32 %v1478_v25  ;;  %v1479_v39 = vadd.f32 1e-05, %v1477_v22  ;;  %v1859_v25 = vld [vmem:[%s3124_s19] ss:$0 sm:$0xff] }
 0x6cb   :  { %2185 = vrsqrt.f32 %v1479_v39 }
 0x6d3   :  { %v2184_v40 = vpop.eup %2183 }
 0x6d4   :  { %v1482_v53 = vmul.f32 %v2184_v40, %v1466_v61  ;;  %v1860_v40 = vld [vmem:[%s3125_s20] ss:$0 sm:$0xff] }
 0x6d5   :  { %v2186_v47 = vpop.eup %2185 }
 0x6d6   :  { %v1490_v30 = vmul.f32 %v1840_v45, %v1482_v53  ;;  %v1483_v19 = vmul.f32 %v2186_v47, %v1467_v16 }
 0x6d8   :  { %v1491_v28 = vmul.f32 %v1840_v45, %v1483_v19  ;;  %v1498_v21 = vadd.f32 %v1841_v49, %v1490_v30 }
 0x6da   :  { %v1499_v54 = vadd.f32 %v1841_v49, %v1491_v28 }
 0x6dc   :  { %v1500_v51 = vpack.c.bf16 %v1499_v54, %v1498_v21 }
 0x6de   :  { %2053 = vmatmul.mubr.msk.bf16.vlgmr.msra.gmra.mrb[44].mxu0 %vm205_vm1, %v1500_v51 }
 0x6df   :  { %2080 = vmatprep.mubr.msk.bf16.mxu0 %vm2415_vm0, %v2414_v0  ;;  %2077 = vmatpush3.bf16.msra.mxu0 %v2117_v1 }
 0x6e0   :  { %2078 = vmatprep.subr.bf16.mxu0 %v2414_v0 }
 0x6e3   :  { %2079 = vmatpush3.bf16.msra.mxu0 %v2118_v13 }
 0x7b1   :  { %v1561_v27 = vpop.f32.mrb[44].mxu0 }
 0x7b2   :  { %v1562_v59 = vadd.f32 %v1842_v26, %v1561_v27  ;;  %v2054_v36 = vpop.f32.mrb[45].mxu0 }
 0x7b3   :  { %v1564_v63 = vpop.f32.mrb[46].mxu0 }
 0x7b4   :  { %v1565_v18 = vadd.f32 %v1842_v26, %v1564_v63  ;;  %v2055_v50 = vpop.f32.mrb[47].mxu0  ;;  %v1568_v42 = vmax.f32 %v1562_v59, 0.0 }
 0x7b6   :  { %v1569_v2 = vmax.f32 %v1565_v18, 0.0 }
 0x7b8   :  { %v1570_v3 = vpack.c.bf16 %v1569_v2, %v1568_v42 }
 0x7ba   :  { %2073 = vmatmul.mubr.bf16.vlgmr.msra.gmra.mrb[36].mxu1 %v1570_v3 }
 0x88d   :  { %v1676_v52 = vpop.f32.mrb[36].mxu1 }
 0x88e   :  { %v2074_v56 = vpop.f32.mrb[37].mxu1  ;;  %v1677_v4 = vadd.f32 %v1846_v20, %v1676_v52 }
 0x88f   :  { %v1679_v58 = vpop.f32.mrb[38].mxu1 }
 0x890   :  { %v1680_v6 = vadd.f32 %v1846_v20, %v1679_v58  ;;  %v2075_v7 = vpop.f32.mrb[39].mxu1 }
 0x892   :  { %v1683_v48 = vpack.c.bf16 %v1680_v6, %v1677_v4 }
 0x894   :  { %2081 = vmatmul.mubr.msk.bf16.vlgmr.msra.gmra.mrb[48].mxu0 %vm205_vm1, %v1683_v48 }
 0x967   :  { %v1744_v0 = vpop.f32.mrb[48].mxu0 }
 0x968   :  { %v1745_v11 = vadd.f32 %v1855_v8, %v1744_v0  ;;  %v2082_v55 = vpop.f32.mrb[49].mxu0 }
 0x969   :  { %v1747_v12 = vpop.f32.mrb[50].mxu0 }
 0x96a   :  { %v1748_v62 = vadd.f32 %v1855_v8, %v1747_v12  ;;  %v2083_v15 = vpop.f32.mrb[51].mxu0  ;;  %v1751_v17 = vadd.f32 %v1745_v11, %v1498_v21 }
 0x96c   :  { %v1755_v23 = vsel %vm205_vm1, %v1751_v17, 0.0  ;;  %v1752_v24 = vadd.f32 %v1748_v62, %v1499_v54 }
 0x96d   :  { %1756 = vadd.xlane.f32.xlu0 %v1755_v23 }
 0x96e   :  { %v1758_v61 = vsel %vm205_vm1, %v1752_v24, 0.0 }
 0x96f   :  { %1759 = vadd.xlane.f32.xlu1 %v1758_v61 }
 0x9fa   :  { %v1757_v29 = vpop.xlane.xlu0 %1756 }
 0x9fb   :  { %v1761_v16 = vmul.f32 0.03125, %v1757_v29 }
 0x9fc   :  { %v1760_v5 = vpop.xlane.xlu1 %1759 }
 0x9fd   :  { %v1763_v31 = vsub.f32 %v1751_v17, %v1761_v16  ;;  %v1762_v57 = vmul.f32 0.03125, %v1760_v5 }
 0x9ff   :  { %v1764_v41 = vsub.f32 %v1752_v24, %v1762_v57  ;;  %v1765_v32 = vmul.f32 %v1763_v31, %v1763_v31 }
 0xa01   :  { %v1767_v43 = vsel %vm205_vm1, %v1765_v32, 0.0  ;;  %v1766_v60 = vmul.f32 %v1764_v41, %v1764_v41 }
 0xa02   :  { %1768 = vadd.xlane.f32.xlu0 %v1767_v43 }
 0xa03   :  { %v1770_v9 = vsel %vm205_vm1, %v1766_v60, 0.0 }
 0xa04   :  { %1771 = vadd.xlane.f32.xlu1 %v1770_v9 }
 0xa8f   :  { %v1769_v33 = vpop.xlane.xlu0 %1768 }
 0xa90   :  { %v1773_v34 = vmul.f32 0.03125, %v1769_v33 }
 0xa91   :  { %v1772_v10 = vpop.xlane.xlu1 %1771 }
 0xa92   :  { %v1775_v35 = vadd.f32 1e-05, %v1773_v34  ;;  %v1774_v37 = vmul.f32 0.03125, %v1772_v10 }
 0xa94   :  { %2187 = vrsqrt.f32 %v1775_v35  ;;  %v1776_v44 = vadd.f32 1e-05, %v1774_v37 }
 0xa96   :  { %2189 = vrsqrt.f32 %v1776_v44 }
 0xa9e   :  { %v2188_v14 = vpop.eup %2187 }
 0xa9f   :  { %v1779_v22 = vmul.f32 %v2188_v14, %v1763_v31 }
 0xaa0   :  { %v2190_v39 = vpop.eup %2189 }
 0xaa1   :  { %v1787_v45 = vmul.f32 %v1859_v25, %v1779_v22  ;;  %v1780_v53 = vmul.f32 %v2190_v39, %v1764_v41 }
 0xaa3   :  { %v1795_v47 = vadd.f32 %v1860_v40, %v1787_v45  ;;  %v1788_v30 = vmul.f32 %v1859_v25, %v1780_v53 }
 0xaa5   :  { %1797 = vst.msk [vmem:[%s3151_s6] sm:$0xff] %vm205_vm1, %v1795_v47  ;;  %v1796_v19 = vadd.f32 %v1860_v40, %v1788_v30 }
 0xaa7   :  { %1798 = vst.msk [vmem:[%s3151_s6 + $0x8] sm:$0xff] %vm205_vm1, %v1796_v19 }
 0xaa8   :  { %1803 = vsyncpa [#allocation3], 1 }
 0xaa9   :  { %1804 = vsyncpa [#allocation5], 1 }
 0xaaa   :  { %1805 = vsyncpa [#allocation8], 1 }
 0xaab   :  { %1806 = vsyncpa [#allocation11], 1 }
 0xaac   :  { %1807 = vsyncpa [#allocation14], 1 }

</bundles_post_ra>
